<compile_context>
chip_gen: v7x
topology: tpu7x:2x2x1
jax: 0.10.0
libtpu: 0.0.40
codegen_flags: <defaults>
</compile_context>

<pallas_src>
import functools
import math

import jax
import jax.numpy as jnp
from jax import lax
from jax.experimental import pallas as pl
from jax.experimental.pallas import tpu as pltpu


def _layer_norm(z, gamma, beta, eps=1e-5):
    # Single fused pass: E[x] and E[x^2] (two accumulations over one sweep).
    m = jnp.mean(z, axis=-1, keepdims=True)
    m2 = jnp.mean(z * z, axis=-1, keepdims=True)
    var = m2 - m * m
    return (z - m) * lax.rsqrt(var + eps) * gamma + beta


def encoder_stack_kernel(x_ref,
                         wqkv_ref, bqkv_ref, wo_ref, bo_ref,
                         g1_ref, be1_ref,
                         w1_ref, bf1_ref, w2_ref, bf2_ref,
                         g2_ref, be2_ref,
                         o_ref, act_ref, *, num_heads):
    """One grid step = (batch element b, encoder layer l).

    Layer axis is innermost, so for a fixed b the activation lives in VMEM
    scratch across all layers; x is DMA'd once per b and o is written once per b.
    """
    l = pl.program_id(1)
    last = pl.num_programs(1) - 1

    @pl.when(l == 0)
    def _():
        act_ref[...] = x_ref[0]

    x = act_ref[...]                                    # (S, H) f32
    S, H = x.shape
    hd = H // num_heads
    scale = 1.0 / math.sqrt(hd)

    # ---- multi-head self-attention --------------------------------------
    # Fused QKV projection: one (S,H)@(H,3H) bf16 matmul, f32 accumulation.
    xb = x.astype(jnp.bfloat16)
    qkv = jnp.dot(xb, wqkv_ref[0], preferred_element_type=jnp.float32)
    qkv = qkv + bqkv_ref[0]                             # (S, 3H) f32

    # Head-major (num_heads, S, hd) operands built from static lane slices;
    # all heads then go through single batched contractions (no matmul loop).
    qh = jnp.stack([qkv[:, h * hd:(h + 1) * hd]
                    for h in range(num_heads)], axis=0).astype(jnp.bfloat16)
    kh = jnp.stack([qkv[:, H + h * hd:H + (h + 1) * hd]
                    for h in range(num_heads)], axis=0).astype(jnp.bfloat16)
    vh = jnp.stack([qkv[:, 2 * H + h * hd:2 * H + (h + 1) * hd]
                    for h in range(num_heads)], axis=0).astype(jnp.bfloat16)

    s = jnp.einsum('hqd,hkd->hqk', qh, kh,
                   preferred_element_type=jnp.float32) * scale   # (nh,S,S) f32
    s = s - jnp.max(s, axis=-1, keepdims=True)
    p = jnp.exp(s)
    p = p * pl.reciprocal(jnp.sum(p, axis=-1, keepdims=True), approx=True)

    ctx = jnp.einsum('hqk,hkd->hqd', p.astype(jnp.bfloat16), vh,
                     preferred_element_type=jnp.float32)          # (nh,S,hd)

    # Concat heads back to (S,H); ONE output-projection matmul.
    ctx_flat = jnp.concatenate([ctx[h] for h in range(num_heads)], axis=-1)
    attn = jnp.dot(ctx_flat.astype(jnp.bfloat16), wo_ref[0],
                   preferred_element_type=jnp.float32) + bo_ref[0]

    # ---- AddNorm 1 (dropout == identity, eval mode) ----------------------
    y = _layer_norm(x + attn, g1_ref[0], be1_ref[0])

    # ---- position-wise FFN: Linear -> ReLU -> Linear ----------------------
    h1 = jnp.dot(y.astype(jnp.bfloat16), w1_ref[0],
                 preferred_element_type=jnp.float32) + bf1_ref[0]
    h1 = jnp.maximum(h1, 0.0)
    ffn = jnp.dot(h1.astype(jnp.bfloat16), w2_ref[0],
                  preferred_element_type=jnp.float32) + bf2_ref[0]

    # ---- AddNorm 2 --------------------------------------------------------
    out = _layer_norm(y + ffn, g2_ref[0], be2_ref[0])

    act_ref[...] = out

    @pl.when(l == last)
    def _():
        o_ref[0] = out


def transformer_encoder_stack(x, params, num_heads):
    """Run all stacked encoder blocks in one pallas_call. x: (B, S, H) f32."""
    B, S, H = x.shape
    L = params["wqkv"].shape[0]
    F = params["w1"].shape[-1]

    order = ["wqkv", "bqkv", "wo", "bo", "g1", "be1",
             "w1", "bf1", "w2", "bf2", "g2", "be2"]
    weights = [params[k] for k in order]          # all are layer-stacked 3-D

    def wspec(arr):
        return pl.BlockSpec((1,) + arr.shape[1:], lambda b, l: (l, 0, 0))

    in_specs = [pl.BlockSpec((1, S, H), lambda b, l: (b, 0, 0))]
    in_specs += [wspec(w) for w in weights]

    nh = num_heads
    flops_per = (2 * S * H * 3 * H        # fused QKV projection
                 + 4 * S * S * H          # scores + context
                 + 2 * S * H * H          # output projection
                 + 4 * S * H * F)         # two FFN matmuls
    cost = pl.CostEstimate(
        flops=int(B * L * flops_per),
        transcendentals=int(B * L * (nh * S * S + nh * S + 2 * S)),
        bytes_accessed=int(2 * x.size * 4
                           + sum(int(w.size) * w.dtype.itemsize for w in weights)),
    )

    return pl.pallas_call(
        functools.partial(encoder_stack_kernel, num_heads=num_heads),
        out_shape=jax.ShapeDtypeStruct((B, S, H), jnp.float32),
        grid_spec=pltpu.PrefetchScalarGridSpec(
            num_scalar_prefetch=0,
            grid=(B, L),
            in_specs=in_specs,
            out_specs=pl.BlockSpec((1, S, H), lambda b, l: (b, 0, 0)),
            scratch_shapes=[pltpu.VMEM((S, H), jnp.float32)],
        ),
        compiler_params=pltpu.CompilerParams(
            dimension_semantics=("parallel", "arbitrary")),
        cost_estimate=cost,
    )(x, *weights)


def init_stacked_params(key, num_layers, H, F):
    keys = jax.random.split(key, num_layers)

    def one(k):
        ks = jax.random.split(k, 6)
        w = lambda kk, shape: jax.random.normal(kk, shape, jnp.float32) * 0.05
        wq, wk, wv = w(ks[0], (H, H)), w(ks[1], (H, H)), w(ks[2], (H, H))
        return dict(
            wqkv=jnp.concatenate([wq, wk, wv], axis=-1),        # (H, 3H)
            bqkv=jnp.zeros((1, 3 * H), jnp.float32),
            wo=w(ks[3], (H, H)), bo=jnp.zeros((1, H), jnp.float32),
            g1=jnp.ones((1, H), jnp.float32), be1=jnp.zeros((1, H), jnp.float32),
            w1=w(ks[4], (H, F)), bf1=jnp.zeros((1, F), jnp.float32),
            w2=w(ks[5], (F, H)), bf2=jnp.zeros((1, H), jnp.float32),
            g2=jnp.ones((1, H), jnp.float32), be2=jnp.zeros((1, H), jnp.float32),
        )

    per_layer = [one(k) for k in keys]
    stacked = jax.tree_util.tree_map(lambda *xs: jnp.stack(xs, 0), *per_layer)
    # bf16 for MXU operands (halves weight DMA/VMEM); biases / LN params stay f32.
    for name in ("wqkv", "wo", "w1", "w2"):
        stacked[name] = stacked[name].astype(jnp.bfloat16)
    return stacked


def positional_encoding(S, H):
    pos = jnp.arange(S, dtype=jnp.float32)[:, None]
    freqs = jnp.power(10000.0, jnp.arange(0, H, 2, dtype=jnp.float32) / H)
    ang = pos / freqs                                    # (S, H//2)
    P = jnp.zeros((S, H), jnp.float32)
    P = P.at[:, 0::2].set(jnp.sin(ang))
    P = P.at[:, 1::2].set(jnp.cos(ang))
    return P


if __name__ == "__main__":
    # Small, module-consistent shapes.
    VOCAB, NUM_HIDDENS, FFN_HIDDENS, NUM_HEADS, NUM_BLKS = 32, 32, 64, 4, 2
    B, S = 2, 8

    key = jax.random.PRNGKey(0)
    k_tok, k_emb, k_blk = jax.random.split(key, 3)

    tokens = jax.random.randint(k_tok, (B, S), 0, VOCAB, dtype=jnp.int32)
    emb_table = jax.random.normal(k_emb, (VOCAB, NUM_HIDDENS), jnp.float32)

    # Glue (plain JAX): embedding gather, sqrt(d) scaling, positional encoding
    # (dropout == identity in eval mode).
    x = jnp.take(emb_table, tokens, axis=0) * math.sqrt(NUM_HIDDENS)   # (B,S,H)
    x = x + positional_encoding(S, NUM_HIDDENS)[None]

    params = init_stacked_params(k_blk, NUM_BLKS, NUM_HIDDENS, FFN_HIDDENS)
    out = transformer_encoder_stack(x, params, NUM_HEADS)

    jax.block_until_ready(out)
    assert out.shape == (B, S, NUM_HIDDENS) and out.dtype == jnp.float32
    print("KERNEL_OK")
</pallas_src>

<mosaic_0001>
module attributes {stable_mosaic.version = 11 : i64} {
  func.func @encoder_stack_kernel(%arg0: i32, %arg1: i32, %arg2: memref<1x8x32xf32, #tpu.memory_space<vmem>>, %arg3: memref<1x32x96xbf16, #tpu.memory_space<vmem>>, %arg4: memref<1x1x96xf32, #tpu.memory_space<vmem>>, %arg5: memref<1x32x32xbf16, #tpu.memory_space<vmem>>, %arg6: memref<1x1x32xf32, #tpu.memory_space<vmem>>, %arg7: memref<1x1x32xf32, #tpu.memory_space<vmem>>, %arg8: memref<1x1x32xf32, #tpu.memory_space<vmem>>, %arg9: memref<1x32x64xbf16, #tpu.memory_space<vmem>>, %arg10: memref<1x1x64xf32, #tpu.memory_space<vmem>>, %arg11: memref<1x64x32xbf16, #tpu.memory_space<vmem>>, %arg12: memref<1x1x32xf32, #tpu.memory_space<vmem>>, %arg13: memref<1x1x32xf32, #tpu.memory_space<vmem>>, %arg14: memref<1x1x32xf32, #tpu.memory_space<vmem>>, %arg15: memref<1x8x32xf32, #tpu.memory_space<vmem>>, %arg16: memref<8x32xf32, #tpu.memory_space<vmem>>) attributes {dimension_semantics = [#tpu.dimension_semantics<parallel>, #tpu.dimension_semantics<arbitrary>], iteration_bounds = array<i64: 2, 2>, scalar_prefetch = 0 : i64, scratch_operands = 1 : i64, tpu.core_type = #tpu.core_type<tc>, window_params = [{transform_indices = @transform_0, window_bounds = array<i64: 1, 8, 32>}, {transform_indices = @transform_1, window_bounds = array<i64: 1, 32, 96>}, {transform_indices = @transform_2, window_bounds = array<i64: 1, 1, 96>}, {transform_indices = @transform_3, window_bounds = array<i64: 1, 32, 32>}, {transform_indices = @transform_4, window_bounds = array<i64: 1, 1, 32>}, {transform_indices = @transform_5, window_bounds = array<i64: 1, 1, 32>}, {transform_indices = @transform_6, window_bounds = array<i64: 1, 1, 32>}, {transform_indices = @transform_7, window_bounds = array<i64: 1, 32, 64>}, {transform_indices = @transform_8, window_bounds = array<i64: 1, 1, 64>}, {transform_indices = @transform_9, window_bounds = array<i64: 1, 64, 32>}, {transform_indices = @transform_10, window_bounds = array<i64: 1, 1, 32>}, {transform_indices = @transform_11, window_bounds = array<i64: 1, 1, 32>}, {transform_indices = @transform_12, window_bounds = array<i64: 1, 1, 32>}, {transform_indices = @transform_13, window_bounds = array<i64: 1, 8, 32>}]} {
    %c0_i32 = arith.constant 0 : i32
    %0 = arith.cmpi eq, %arg1, %c0_i32 : i32
    %1 = arith.extui %0 : i1 to i32
    %c0_i32_0 = arith.constant 0 : i32
    %2 = arith.cmpi ne, %1, %c0_i32_0 : i32
    scf.if %2 {
      %c0_60 = arith.constant 0 : index
      %c0_61 = arith.constant 0 : index
      %c0_62 = arith.constant 0 : index
      %150 = vector.load %arg2[%c0_60, %c0_61, %c0_62] : memref<1x8x32xf32, #tpu.memory_space<vmem>>, vector<1x8x32xf32>
      %151 = vector.shape_cast %150 : vector<1x8x32xf32> to vector<8x32xf32>
      %c0_63 = arith.constant 0 : index
      %c0_64 = arith.constant 0 : index
      %152 = vector.load %arg16[%c0_63, %c0_64] : memref<8x32xf32, #tpu.memory_space<vmem>>, vector<8x32xf32>
      tpu.vector_store %arg16[%c0_63, %c0_64], %151 {strides = array<i32>} : memref<8x32xf32, #tpu.memory_space<vmem>>, vector<8x32xf32>,
    } else {
    }
    %c0 = arith.constant 0 : index
    %c0_1 = arith.constant 0 : index
    %3 = vector.load %arg16[%c0, %c0_1] : memref<8x32xf32, #tpu.memory_space<vmem>>, vector<8x32xf32>
    %4 = arith.truncf %3 : vector<8x32xf32> to vector<8x32xbf16>
    %c0_2 = arith.constant 0 : index
    %c0_3 = arith.constant 0 : index
    %c0_4 = arith.constant 0 : index
    %5 = vector.load %arg3[%c0_2, %c0_3, %c0_4] : memref<1x32x96xbf16, #tpu.memory_space<vmem>>, vector<1x32x96xbf16>
    %6 = vector.shape_cast %5 : vector<1x32x96xbf16> to vector<32x96xbf16>
    %cst = arith.constant dense<0.000000e+00> : vector<8x96xf32>
    %7 = tpu.matmul %4, %6, %cst {dimension_numbers = #tpu.dot_dimension_numbers<[1], [0], [0], [1], [0, 0, 1, 1], [], []>} : vector<8x32xbf16>, vector<32x96xbf16>, vector<8x96xf32> -> vector<8x96xf32>
    %c0_5 = arith.constant 0 : index
    %c0_6 = arith.constant 0 : index
    %c0_7 = arith.constant 0 : index
    %8 = vector.load %arg4[%c0_5, %c0_6, %c0_7] : memref<1x1x96xf32, #tpu.memory_space<vmem>>, vector<1x1x96xf32>
    %9 = vector.shape_cast %8 : vector<1x1x96xf32> to vector<1x96xf32>
    %10 = vector.broadcast %9 : vector<1x96xf32> to vector<8x96xf32>
    %11 = arith.addf %7, %10 : vector<8x96xf32>
    %12 = vector.extract_strided_slice %11 {offsets = [0, 0], sizes = [8, 8], strides = [1, 1]} : vector<8x96xf32> to vector<8x8xf32>
    %13 = vector.extract_strided_slice %11 {offsets = [0, 8], sizes = [8, 8], strides = [1, 1]} : vector<8x96xf32> to vector<8x8xf32>
    %14 = vector.extract_strided_slice %11 {offsets = [0, 16], sizes = [8, 8], strides = [1, 1]} : vector<8x96xf32> to vector<8x8xf32>
    %15 = vector.extract_strided_slice %11 {offsets = [0, 24], sizes = [8, 8], strides = [1, 1]} : vector<8x96xf32> to vector<8x8xf32>
    %16 = vector.shape_cast %12 : vector<8x8xf32> to vector<1x8x8xf32>
    %17 = vector.shape_cast %13 : vector<8x8xf32> to vector<1x8x8xf32>
    %18 = vector.shape_cast %14 : vector<8x8xf32> to vector<1x8x8xf32>
    %19 = vector.shape_cast %15 : vector<8x8xf32> to vector<1x8x8xf32>
    %20 = tpu.concatenate %16, %17, %18, %19 in 0 : vector<1x8x8xf32>, vector<1x8x8xf32>, vector<1x8x8xf32>, vector<1x8x8xf32> -> vector<4x8x8xf32>
    %21 = arith.truncf %20 : vector<4x8x8xf32> to vector<4x8x8xbf16>
    %22 = vector.extract_strided_slice %11 {offsets = [0, 32], sizes = [8, 8], strides = [1, 1]} : vector<8x96xf32> to vector<8x8xf32>
    %23 = vector.extract_strided_slice %11 {offsets = [0, 40], sizes = [8, 8], strides = [1, 1]} : vector<8x96xf32> to vector<8x8xf32>
    %24 = vector.extract_strided_slice %11 {offsets = [0, 48], sizes = [8, 8], strides = [1, 1]} : vector<8x96xf32> to vector<8x8xf32>
    %25 = vector.extract_strided_slice %11 {offsets = [0, 56], sizes = [8, 8], strides = [1, 1]} : vector<8x96xf32> to vector<8x8xf32>
    %26 = vector.shape_cast %22 : vector<8x8xf32> to vector<1x8x8xf32>
    %27 = vector.shape_cast %23 : vector<8x8xf32> to vector<1x8x8xf32>
    %28 = vector.shape_cast %24 : vector<8x8xf32> to vector<1x8x8xf32>
    %29 = vector.shape_cast %25 : vector<8x8xf32> to vector<1x8x8xf32>
    %30 = tpu.concatenate %26, %27, %28, %29 in 0 : vector<1x8x8xf32>, vector<1x8x8xf32>, vector<1x8x8xf32>, vector<1x8x8xf32> -> vector<4x8x8xf32>
    %31 = arith.truncf %30 : vector<4x8x8xf32> to vector<4x8x8xbf16>
    %32 = vector.extract_strided_slice %11 {offsets = [0, 64], sizes = [8, 8], strides = [1, 1]} : vector<8x96xf32> to vector<8x8xf32>
    %33 = vector.extract_strided_slice %11 {offsets = [0, 72], sizes = [8, 8], strides = [1, 1]} : vector<8x96xf32> to vector<8x8xf32>
    %34 = vector.extract_strided_slice %11 {offsets = [0, 80], sizes = [8, 8], strides = [1, 1]} : vector<8x96xf32> to vector<8x8xf32>
    %35 = vector.extract_strided_slice %11 {offsets = [0, 88], sizes = [8, 8], strides = [1, 1]} : vector<8x96xf32> to vector<8x8xf32>
    %36 = vector.shape_cast %32 : vector<8x8xf32> to vector<1x8x8xf32>
    %37 = vector.shape_cast %33 : vector<8x8xf32> to vector<1x8x8xf32>
    %38 = vector.shape_cast %34 : vector<8x8xf32> to vector<1x8x8xf32>
    %39 = vector.shape_cast %35 : vector<8x8xf32> to vector<1x8x8xf32>
    %40 = tpu.concatenate %36, %37, %38, %39 in 0 : vector<1x8x8xf32>, vector<1x8x8xf32>, vector<1x8x8xf32>, vector<1x8x8xf32> -> vector<4x8x8xf32>
    %41 = arith.truncf %40 : vector<4x8x8xf32> to vector<4x8x8xbf16>
    "tpu.trace_start"() <{level = 10 : i32, message = "hqd,hkd->hqk"}> : () -> ()
    %cst_8 = arith.constant dense<0.000000e+00> : vector<4x8x8xf32>
    %42 = tpu.matmul %21, %31, %cst_8 {dimension_numbers = #tpu.dot_dimension_numbers<[2], [2], [1], [1], [0, 0, 0, 1, 1, 1], [0], [0]>} : vector<4x8x8xbf16>, vector<4x8x8xbf16>, vector<4x8x8xf32> -> vector<4x8x8xf32>
    "tpu.trace_stop"() : () -> ()
    %cst_9 = arith.constant 0.353553385 : f32
    %43 = vector.broadcast %cst_9 : f32 to vector<4x8x8xf32>
    %44 = arith.mulf %42, %43 : vector<4x8x8xf32>
    %cst_10 = arith.constant dense<0xFF800000> : vector<4x8xf32>
    %45 = vector.multi_reduction <maximumf>, %44, %cst_10 [2] : vector<4x8x8xf32> to vector<4x8xf32>
    %46 = vector.shape_cast %45 : vector<4x8xf32> to vector<4x8x1xf32>
    %47 = vector.broadcast %46 : vector<4x8x1xf32> to vector<4x8x8xf32>
    %48 = arith.subf %44, %47 : vector<4x8x8xf32>
    %49 = math.exp %48 : vector<4x8x8xf32>
    %cst_11 = arith.constant dense<0.000000e+00> : vector<4x8xf32>
    %50 = vector.multi_reduction <add>, %49, %cst_11 [2] : vector<4x8x8xf32> to vector<4x8xf32>
    %51 = vector.shape_cast %50 : vector<4x8xf32> to vector<4x8x1xf32>
    %52 = tpu.reciprocal %51 {approx = true} : vector<4x8x1xf32> -> vector<4x8x1xf32>
    %53 = vector.broadcast %52 : vector<4x8x1xf32> to vector<4x8x8xf32>
    %54 = arith.mulf %49, %53 : vector<4x8x8xf32>
    %55 = arith.truncf %54 : vector<4x8x8xf32> to vector<4x8x8xbf16>
    "tpu.trace_start"() <{level = 10 : i32, message = "hqk,hkd->hqd"}> : () -> ()
    %cst_12 = arith.constant dense<0.000000e+00> : vector<4x8x8xf32>
    %56 = tpu.matmul %55, %41, %cst_12 {dimension_numbers = #tpu.dot_dimension_numbers<[2], [1], [1], [2], [0, 0, 0, 1, 1, 2], [0], [0]>} : vector<4x8x8xbf16>, vector<4x8x8xbf16>, vector<4x8x8xf32> -> vector<4x8x8xf32>
    "tpu.trace_stop"() : () -> ()
    %57 = vector.extract_strided_slice %56 {offsets = [0, 0, 0], sizes = [1, 8, 8], strides = [1, 1, 1]} : vector<4x8x8xf32> to vector<1x8x8xf32>
    %58 = vector.shape_cast %57 : vector<1x8x8xf32> to vector<8x8xf32>
    %59 = vector.extract_strided_slice %56 {offsets = [1, 0, 0], sizes = [1, 8, 8], strides = [1, 1, 1]} : vector<4x8x8xf32> to vector<1x8x8xf32>
    %60 = vector.shape_cast %59 : vector<1x8x8xf32> to vector<8x8xf32>
    %61 = vector.extract_strided_slice %56 {offsets = [2, 0, 0], sizes = [1, 8, 8], strides = [1, 1, 1]} : vector<4x8x8xf32> to vector<1x8x8xf32>
    %62 = vector.shape_cast %61 : vector<1x8x8xf32> to vector<8x8xf32>
    %63 = vector.extract_strided_slice %56 {offsets = [3, 0, 0], sizes = [1, 8, 8], strides = [1, 1, 1]} : vector<4x8x8xf32> to vector<1x8x8xf32>
    %64 = vector.shape_cast %63 : vector<1x8x8xf32> to vector<8x8xf32>
    %65 = tpu.concatenate %58, %60, %62, %64 in 1 : vector<8x8xf32>, vector<8x8xf32>, vector<8x8xf32>, vector<8x8xf32> -> vector<8x32xf32>
    %66 = arith.truncf %65 : vector<8x32xf32> to vector<8x32xbf16>
    %c0_13 = arith.constant 0 : index
    %c0_14 = arith.constant 0 : index
    %c0_15 = arith.constant 0 : index
    %67 = vector.load %arg5[%c0_13, %c0_14, %c0_15] : memref<1x32x32xbf16, #tpu.memory_space<vmem>>, vector<1x32x32xbf16>
    %68 = vector.shape_cast %67 : vector<1x32x32xbf16> to vector<32x32xbf16>
    %cst_16 = arith.constant dense<0.000000e+00> : vector<8x32xf32>
    %69 = tpu.matmul %66, %68, %cst_16 {dimension_numbers = #tpu.dot_dimension_numbers<[1], [0], [0], [1], [0, 0, 1, 1], [], []>} : vector<8x32xbf16>, vector<32x32xbf16>, vector<8x32xf32> -> vector<8x32xf32>
    %c0_17 = arith.constant 0 : index
    %c0_18 = arith.constant 0 : index
    %c0_19 = arith.constant 0 : index
    %70 = vector.load %arg6[%c0_17, %c0_18, %c0_19] : memref<1x1x32xf32, #tpu.memory_space<vmem>>, vector<1x1x32xf32>
    %71 = vector.shape_cast %70 : vector<1x1x32xf32> to vector<1x32xf32>
    %72 = vector.broadcast %71 : vector<1x32xf32> to vector<8x32xf32>
    %73 = arith.addf %69, %72 : vector<8x32xf32>
    %74 = arith.addf %3, %73 : vector<8x32xf32>
    %c0_20 = arith.constant 0 : index
    %c0_21 = arith.constant 0 : index
    %c0_22 = arith.constant 0 : index
    %75 = vector.load %arg7[%c0_20, %c0_21, %c0_22] : memref<1x1x32xf32, #tpu.memory_space<vmem>>, vector<1x1x32xf32>
    %76 = vector.shape_cast %75 : vector<1x1x32xf32> to vector<1x32xf32>
    %c0_23 = arith.constant 0 : index
    %c0_24 = arith.constant 0 : index
    %c0_25 = arith.constant 0 : index
    %77 = vector.load %arg8[%c0_23, %c0_24, %c0_25] : memref<1x1x32xf32, #tpu.memory_space<vmem>>, vector<1x1x32xf32>
    %78 = vector.shape_cast %77 : vector<1x1x32xf32> to vector<1x32xf32>
    %cst_26 = arith.constant dense<0.000000e+00> : vector<8xf32>
    %79 = vector.multi_reduction <add>, %74, %cst_26 [1] : vector<8x32xf32> to vector<8xf32>
    %80 = vector.shape_cast %79 : vector<8xf32> to vector<8x1xf32>
    %cst_27 = arith.constant 3.200000e+01 : f32
    %81 = vector.broadcast %cst_27 : f32 to vector<8x1xf32>
    %82 = arith.divf %80, %81 : vector<8x1xf32>
    %83 = arith.mulf %74, %74 : vector<8x32xf32>
    %cst_28 = arith.constant dense<0.000000e+00> : vector<8xf32>
    %84 = vector.multi_reduction <add>, %83, %cst_28 [1] : vector<8x32xf32> to vector<8xf32>
    %85 = vector.shape_cast %84 : vector<8xf32> to vector<8x1xf32>
    %cst_29 = arith.constant 3.200000e+01 : f32
    %86 = vector.broadcast %cst_29 : f32 to vector<8x1xf32>
    %87 = arith.divf %85, %86 : vector<8x1xf32>
    %88 = arith.mulf %82, %82 : vector<8x1xf32>
    %89 = arith.subf %87, %88 : vector<8x1xf32>
    %90 = vector.broadcast %82 : vector<8x1xf32> to vector<8x32xf32>
    %91 = arith.subf %74, %90 : vector<8x32xf32>
    %cst_30 = arith.constant 9.99999974E-6 : f32
    %92 = vector.broadcast %cst_30 : f32 to vector<8x1xf32>
    %93 = arith.addf %89, %92 : vector<8x1xf32>
    %94 = math.rsqrt %93 : vector<8x1xf32>
    %95 = vector.broadcast %94 : vector<8x1xf32> to vector<8x32xf32>
    %96 = arith.mulf %91, %95 : vector<8x32xf32>
    %97 = vector.broadcast %76 : vector<1x32xf32> to vector<8x32xf32>
    %98 = arith.mulf %96, %97 : vector<8x32xf32>
    %99 = vector.broadcast %78 : vector<1x32xf32> to vector<8x32xf32>
    %100 = arith.addf %98, %99 : vector<8x32xf32>
    %101 = arith.truncf %100 : vector<8x32xf32> to vector<8x32xbf16>
    %c0_31 = arith.constant 0 : index
    %c0_32 = arith.constant 0 : index
    %c0_33 = arith.constant 0 : index
    %102 = vector.load %arg9[%c0_31, %c0_32, %c0_33] : memref<1x32x64xbf16, #tpu.memory_space<vmem>>, vector<1x32x64xbf16>
    %103 = vector.shape_cast %102 : vector<1x32x64xbf16> to vector<32x64xbf16>
    %cst_34 = arith.constant dense<0.000000e+00> : vector<8x64xf32>
    %104 = tpu.matmul %101, %103, %cst_34 {dimension_numbers = #tpu.dot_dimension_numbers<[1], [0], [0], [1], [0, 0, 1, 1], [], []>} : vector<8x32xbf16>, vector<32x64xbf16>, vector<8x64xf32> -> vector<8x64xf32>
    %c0_35 = arith.constant 0 : index
    %c0_36 = arith.constant 0 : index
    %c0_37 = arith.constant 0 : index
    %105 = vector.load %arg10[%c0_35, %c0_36, %c0_37] : memref<1x1x64xf32, #tpu.memory_space<vmem>>, vector<1x1x64xf32>
    %106 = vector.shape_cast %105 : vector<1x1x64xf32> to vector<1x64xf32>
    %107 = vector.broadcast %106 : vector<1x64xf32> to vector<8x64xf32>
    %108 = arith.addf %104, %107 : vector<8x64xf32>
    %cst_38 = arith.constant 0.000000e+00 : f32
    %109 = vector.broadcast %cst_38 : f32 to vector<8x64xf32>
    %110 = arith.maximumf %108, %109 : vector<8x64xf32>
    %111 = arith.truncf %110 : vector<8x64xf32> to vector<8x64xbf16>
    %c0_39 = arith.constant 0 : index
    %c0_40 = arith.constant 0 : index
    %c0_41 = arith.constant 0 : index
    %112 = vector.load %arg11[%c0_39, %c0_40, %c0_41] : memref<1x64x32xbf16, #tpu.memory_space<vmem>>, vector<1x64x32xbf16>
    %113 = vector.shape_cast %112 : vector<1x64x32xbf16> to vector<64x32xbf16>
    %cst_42 = arith.constant dense<0.000000e+00> : vector<8x32xf32>
    %114 = tpu.matmul %111, %113, %cst_42 {dimension_numbers = #tpu.dot_dimension_numbers<[1], [0], [0], [1], [0, 0, 1, 1], [], []>} : vector<8x64xbf16>, vector<64x32xbf16>, vector<8x32xf32> -> vector<8x32xf32>
    %c0_43 = arith.constant 0 : index
    %c0_44 = arith.constant 0 : index
    %c0_45 = arith.constant 0 : index
    %115 = vector.load %arg12[%c0_43, %c0_44, %c0_45] : memref<1x1x32xf32, #tpu.memory_space<vmem>>, vector<1x1x32xf32>
    %116 = vector.shape_cast %115 : vector<1x1x32xf32> to vector<1x32xf32>
    %117 = vector.broadcast %116 : vector<1x32xf32> to vector<8x32xf32>
    %118 = arith.addf %114, %117 : vector<8x32xf32>
    %119 = arith.addf %100, %118 : vector<8x32xf32>
    %c0_46 = arith.constant 0 : index
    %c0_47 = arith.constant 0 : index
    %c0_48 = arith.constant 0 : index
    %120 = vector.load %arg13[%c0_46, %c0_47, %c0_48] : memref<1x1x32xf32, #tpu.memory_space<vmem>>, vector<1x1x32xf32>
    %121 = vector.shape_cast %120 : vector<1x1x32xf32> to vector<1x32xf32>
    %c0_49 = arith.constant 0 : index
    %c0_50 = arith.constant 0 : index
    %c0_51 = arith.constant 0 : index
    %122 = vector.load %arg14[%c0_49, %c0_50, %c0_51] : memref<1x1x32xf32, #tpu.memory_space<vmem>>, vector<1x1x32xf32>
    %123 = vector.shape_cast %122 : vector<1x1x32xf32> to vector<1x32xf32>
    %cst_52 = arith.constant dense<0.000000e+00> : vector<8xf32>
    %124 = vector.multi_reduction <add>, %119, %cst_52 [1] : vector<8x32xf32> to vector<8xf32>
    %125 = vector.shape_cast %124 : vector<8xf32> to vector<8x1xf32>
    %cst_53 = arith.constant 3.200000e+01 : f32
    %126 = vector.broadcast %cst_53 : f32 to vector<8x1xf32>
    %127 = arith.divf %125, %126 : vector<8x1xf32>
    %128 = arith.mulf %119, %119 : vector<8x32xf32>
    %cst_54 = arith.constant dense<0.000000e+00> : vector<8xf32>
    %129 = vector.multi_reduction <add>, %128, %cst_54 [1] : vector<8x32xf32> to vector<8xf32>
    %130 = vector.shape_cast %129 : vector<8xf32> to vector<8x1xf32>
    %cst_55 = arith.constant 3.200000e+01 : f32
    %131 = vector.broadcast %cst_55 : f32 to vector<8x1xf32>
    %132 = arith.divf %130, %131 : vector<8x1xf32>
    %133 = arith.mulf %127, %127 : vector<8x1xf32>
    %134 = arith.subf %132, %133 : vector<8x1xf32>
    %135 = vector.broadcast %127 : vector<8x1xf32> to vector<8x32xf32>
    %136 = arith.subf %119, %135 : vector<8x32xf32>
    %cst_56 = arith.constant 9.99999974E-6 : f32
    %137 = vector.broadcast %cst_56 : f32 to vector<8x1xf32>
    %138 = arith.addf %134, %137 : vector<8x1xf32>
    %139 = math.rsqrt %138 : vector<8x1xf32>
    %140 = vector.broadcast %139 : vector<8x1xf32> to vector<8x32xf32>
    %141 = arith.mulf %136, %140 : vector<8x32xf32>
    %142 = vector.broadcast %121 : vector<1x32xf32> to vector<8x32xf32>
    %143 = arith.mulf %141, %142 : vector<8x32xf32>
    %144 = vector.broadcast %123 : vector<1x32xf32> to vector<8x32xf32>
    %145 = arith.addf %143, %144 : vector<8x32xf32>
    %c0_57 = arith.constant 0 : index
    %c0_58 = arith.constant 0 : index
    %146 = vector.load %arg16[%c0_57, %c0_58] : memref<8x32xf32, #tpu.memory_space<vmem>>, vector<8x32xf32>
    tpu.vector_store %arg16[%c0_57, %c0_58], %145 {strides = array<i32>} : memref<8x32xf32, #tpu.memory_space<vmem>>, vector<8x32xf32>,
    %c1_i32 = arith.constant 1 : i32
    %147 = arith.cmpi eq, %arg1, %c1_i32 : i32
    %148 = arith.extui %147 : i1 to i32
    %c0_i32_59 = arith.constant 0 : i32
    %149 = arith.cmpi ne, %148, %c0_i32_59 : i32
    scf.if %149 {
      %c0_60 = arith.constant 0 : index
      %c0_61 = arith.constant 0 : index
      %c0_62 = arith.constant 0 : index
      %150 = vector.load %arg15[%c0_60, %c0_61, %c0_62] : memref<1x8x32xf32, #tpu.memory_space<vmem>>, vector<1x8x32xf32>
      %151 = vector.shape_cast %150 : vector<1x8x32xf32> to vector<8x32xf32>
      %152 = vector.shape_cast %145 : vector<8x32xf32> to vector<1x8x32xf32>
      tpu.vector_store %arg15[%c0_60, %c0_61, %c0_62], %152 {strides = array<i32>} : memref<1x8x32xf32, #tpu.memory_space<vmem>>, vector<1x8x32xf32>,
    } else {
    }
    return
  }
  func.func @transform_0(%arg0: i32, %arg1: i32) -> (i32, i32, i32) {
    %c0_i32 = arith.constant 0 : i32
    %c0_i32_0 = arith.constant 0 : i32
    %c0_i32_1 = arith.constant 0 : i32
    return %arg0, %c0_i32, %c0_i32_0 : i32, i32, i32
  }
  func.func @transform_1(%arg0: i32, %arg1: i32) -> (i32, i32, i32) {
    %c0_i32 = arith.constant 0 : i32
    %c0_i32_0 = arith.constant 0 : i32
    %c0_i32_1 = arith.constant 0 : i32
    return %arg1, %c0_i32, %c0_i32_0 : i32, i32, i32
  }
  func.func @transform_2(%arg0: i32, %arg1: i32) -> (i32, i32, i32) {
    %c0_i32 = arith.constant 0 : i32
    %c0_i32_0 = arith.constant 0 : i32
    %c0_i32_1 = arith.constant 0 : i32
    return %arg1, %c0_i32, %c0_i32_0 : i32, i32, i32
  }
  func.func @transform_3(%arg0: i32, %arg1: i32) -> (i32, i32, i32) {
    %c0_i32 = arith.constant 0 : i32
    %c0_i32_0 = arith.constant 0 : i32
    %c0_i32_1 = arith.constant 0 : i32
    return %arg1, %c0_i32, %c0_i32_0 : i32, i32, i32
  }
  func.func @transform_4(%arg0: i32, %arg1: i32) -> (i32, i32, i32) {
    %c0_i32 = arith.constant 0 : i32
    %c0_i32_0 = arith.constant 0 : i32
    %c0_i32_1 = arith.constant 0 : i32
    return %arg1, %c0_i32, %c0_i32_0 : i32, i32, i32
  }
  func.func @transform_5(%arg0: i32, %arg1: i32) -> (i32, i32, i32) {
    %c0_i32 = arith.constant 0 : i32
    %c0_i32_0 = arith.constant 0 : i32
    %c0_i32_1 = arith.constant 0 : i32
    return %arg1, %c0_i32, %c0_i32_0 : i32, i32, i32
  }
  func.func @transform_6(%arg0: i32, %arg1: i32) -> (i32, i32, i32) {
    %c0_i32 = arith.constant 0 : i32
    %c0_i32_0 = arith.constant 0 : i32
    %c0_i32_1 = arith.constant 0 : i32
    return %arg1, %c0_i32, %c0_i32_0 : i32, i32, i32
  }
  func.func @transform_7(%arg0: i32, %arg1: i32) -> (i32, i32, i32) {
    %c0_i32 = arith.constant 0 : i32
    %c0_i32_0 = arith.constant 0 : i32
    %c0_i32_1 = arith.constant 0 : i32
    return %arg1, %c0_i32, %c0_i32_0 : i32, i32, i32
  }
  func.func @transform_8(%arg0: i32, %arg1: i32) -> (i32, i32, i32) {
    %c0_i32 = arith.constant 0 : i32
    %c0_i32_0 = arith.constant 0 : i32
    %c0_i32_1 = arith.constant 0 : i32
    return %arg1, %c0_i32, %c0_i32_0 : i32, i32, i32
  }
  func.func @transform_9(%arg0: i32, %arg1: i32) -> (i32, i32, i32) {
    %c0_i32 = arith.constant 0 : i32
    %c0_i32_0 = arith.constant 0 : i32
    %c0_i32_1 = arith.constant 0 : i32
    return %arg1, %c0_i32, %c0_i32_0 : i32, i32, i32
  }
  func.func @transform_10(%arg0: i32, %arg1: i32) -> (i32, i32, i32) {
    %c0_i32 = arith.constant 0 : i32
    %c0_i32_0 = arith.constant 0 : i32
    %c0_i32_1 = arith.constant 0 : i32
    return %arg1, %c0_i32, %c0_i32_0 : i32, i32, i32
  }
  func.func @transform_11(%arg0: i32, %arg1: i32) -> (i32, i32, i32) {
    %c0_i32 = arith.constant 0 : i32
    %c0_i32_0 = arith.constant 0 : i32
    %c0_i32_1 = arith.constant 0 : i32
    return %arg1, %c0_i32, %c0_i32_0 : i32, i32, i32
  }
  func.func @transform_12(%arg0: i32, %arg1: i32) -> (i32, i32, i32) {
    %c0_i32 = arith.constant 0 : i32
    %c0_i32_0 = arith.constant 0 : i32
    %c0_i32_1 = arith.constant 0 : i32
    return %arg1, %c0_i32, %c0_i32_0 : i32, i32, i32
  }
  func.func @transform_13(%arg0: i32, %arg1: i32) -> (i32, i32, i32) {
    %c0_i32 = arith.constant 0 : i32
    %c0_i32_0 = arith.constant 0 : i32
    %c0_i32_1 = arith.constant 0 : i32
    return %arg0, %c0_i32, %c0_i32_0 : i32, i32, i32
  }
}

</mosaic_0001>

<bundles_post_ra>
// kernel: tpu_custom_call.1
= control target key start
LH: loop header
LB: loop body
LE: loop exit
PB: predicated region body
PF: predicated region fallthrough
CT: control target
= control target key end

     0   :  { %s3118_s0 = inlined_call_operand.hbm [shape: f32[2,8,32], index: 0, kind: input, shape index: {}]   ;;  %s3119_s1 = inlined_call_operand.vmem [shape: bf16[2,32,96], index: 1, kind: input, shape index: {}]   ;;  %s3120_s2 = inlined_call_operand.vmem [shape: f32[2,1,96], index: 2, kind: input, shape index: {}]   ;;  %s3121_s3 = inlined_call_operand.vmem [shape: bf16[2,32,32], index: 3, kind: input, shape index: {}]   ;;  %s3122_s4 = inlined_call_operand.hbm [shape: f32[2,1,32], index: 4, kind: input, shape index: {}]   ;;  %s3123_s5 = inlined_call_operand.hbm [shape: f32[2,1,32], index: 5, kind: input, shape index: {}]   ;;  %s3124_s6 = inlined_call_operand.hbm [shape: f32[2,1,32], index: 6, kind: input, shape index: {}]   ;;  %s3125_s7 = inlined_call_operand.vmem [shape: bf16[2,32,64], index: 7, kind: input, shape index: {}]   ;;  %s3126_s8 = inlined_call_operand.hbm [shape: f32[2,1,64], index: 8, kind: input, shape index: {}]   ;;  %s3127_s9 = inlined_call_operand.vmem [shape: bf16[2,64,32], index: 9, kind: input, shape index: {}]   ;;  %s3128_s10 = inlined_call_operand.vmem [shape: f32[2,1,32], index: 10, kind: input, shape index: {}]   ;;  %s3129_s11 = inlined_call_operand.vmem [shape: f32[2,1,32], index: 11, kind: input, shape index: {}]   ;;  %s3130_s12 = inlined_call_operand.vmem [shape: f32[2,1,32], index: 12, kind: input, shape index: {}]   ;;  %s3131_s13 = inlined_call_operand.hbm [shape: f32[2,8,32], index: 13, kind: output, shape index: {}]  }
   0x1   :  { %3155 = sst [smem:[#allocation32_spill]] %s3118_s0 }
   0x2   :  { %3156 = sst [smem:[#allocation33_spill]] %s3119_s1 }
   0x3   :  { %3157 = sst [smem:[#allocation34_spill]] %s3120_s2 }
   0x4   :  { %3158 = sst [smem:[#allocation35_spill]] %s3121_s3 }
   0x5   :  { %3159 = sst [smem:[#allocation36_spill]] %s3122_s4 }
   0x6   :  { %3160 = sst [smem:[#allocation37_spill]] %s3123_s5 }
   0x7   :  { %3161 = sst [smem:[#allocation38_spill]] %s3124_s6 }
   0x8   :  { %3162 = sst [smem:[#allocation39_spill]] %s3125_s7 }
   0x9   :  { %3163 = sst [smem:[#allocation40_spill]] %s3126_s8 }
   0xa   :  { %3164 = sst [smem:[#allocation41_spill]] %s3127_s9 }
   0xb   :  { %3165 = sst [smem:[#allocation42_spill]] %s3128_s10 }
   0xc   :  { %3166 = sst [smem:[#allocation43_spill]] %s3129_s11 }
   0xd   :  { %3167 = sst [smem:[#allocation44_spill]] %s3130_s12 }
   0xe   :  { %3168 = sst [smem:[#allocation45_spill]] %s3131_s13 }
   0xf   :  { %18 = vsyncpa [#allocation4], 0 }
  0x10   :  { %20 = vsyncpa [#allocation4 + $0x1], 0 }
  0x11   :  { %21 = vsyncpa [#allocation7], 0 }
  0x12   :  { %23 = vsyncpa [#allocation7 + $0x1], 0 }
  0x13   :  { %24 = vsyncpa [#allocation10], 0 }
  0x14   :  { %26 = vsyncpa [#allocation10 + $0x1], 0 }
  0x15   :  { %27 = vsyncpa [#allocation5], 0 }
  0x16   :  { %29 = vsyncpa [#allocation5 + $0x1], 0  ;;  %s2532_s25 = smov 0   ;;  %s2534_s26 = smov 0  }
  0x17   :  { %s2536_s27 = smov 0   ;;  %s2538_s28 = smov 0  }
  0x18   :  { %s2540_s29 = smov 0   ;;  %s2542_s30 = smov 0  }
  0x19   :  { %s2544_s14 = smov 0   ;;  %s2546_s15 = smov 0  }
  0x1a   :  { %s2548_s16 = smov 0   ;;  %s2550_s17 = smov 0  }
  0x1b   :  { %s2552_s18 = smov 0  }
  0x1c LB: > { %3169 = sst [smem:[#allocation17_spill]] %s2408_s26  ;;  %s44_s19 = sadd.s32 1, %s2436_s16  ;;  %s2444_s18 = sphi %s2552_s18, %s35_s18   ;;  %s2440_s17 = sphi %s2550_s17, %s3246_s17   ;;  %s2436_s16 = sphi %s2548_s16, %s3245_s16   ;;  %s2432_s15 = sphi %s2546_s15, %s3244_s15   ;;  %s2428_s14 = sphi %s2544_s14, %s3243_s14   ;;  %s2424_s30 = sphi %s2542_s30, %s3242_s30   ;;  %s2420_s29 = sphi %s2540_s29, %s3241_s29   ;;  %s2416_s28 = sphi %s2538_s28, %s3240_s28   ;;  %s2412_s27 = sphi %s2536_s27, %s3239_s27   ;;  %s2408_s26 = sphi %s2534_s26, %s3238_s26   ;;  %s2404_s25 = sphi %s2532_s25, %s3237_s25  }
  0x1d   : > { %3170 = sst [smem:[#allocation18_spill]] %s2412_s27  ;;  %p3137_p0 = scmp.eq.s32.totalorder %s2444_s18, 0 }
  0x1e   : > { %3171 = sst [smem:[#allocation19_spill]] %s2416_s28  ;;  %p2589_p1 = scmp.ge.s32.totalorder %s44_s19, 2 }
  0x1f   : > { %3172 = sst [smem:[#allocation20_spill]] %s2420_s29  ;;  %s158_s21 = sadd.s32 1, %s2412_s27 }
  0x20   : > { %3173 = sst [smem:[#allocation21_spill]] %s2424_s30  ;;  %p165_p2 = scmp.ne.s32.totalorder %s2412_s27, %s2408_s26 }
  0x21   : > { %3174 = sst [smem:[#allocation22_spill]] %s2428_s14  ;;  %s3248_s19 = smov (%p2589_p1, %s44_s19), 0 }
  0x22   : > { %3175 = sst [smem:[#allocation23_spill]] %s2432_s15  ;;  %p167_p4 = por %p165_p2, %p3137_p0 }
  0x23   : > { %3176 = sst [smem:[#allocation24_spill]] %s2436_s16  ;;  %s155_s22 = ssub.s32 %s2436_s16, %s3248_s19 }
  0x24   : > { %3177 = sst [smem:[#allocation25_spill]] %s2440_s17  ;;  %p3136_p5 = scmp.lt.s32.totalorder %s2444_s18, 4 }
  0x25   : > { %s3178_s20 = scalar_select %p2589_p1, 1, 0 }
  0x26   : > { %3179 = sst [smem:[#allocation26_spill]] %s3248_s19  ;;  %p156_p6 = scmp.eq.s32.totalorder %s155_s22, 0 }
  0x27   : > { %s3138_s23 = sand.u32 1, %s2444_s18   ;;  %s2609_s24 = sand.u32 1, %s2412_s27  }
  0x28   : > { %s2612_s13 = scalar_select %p156_p6, %s2412_s27, %s158_s21  }
  0x29   : > { %s2615_s15 = sshll.u32 %s2436_s16, 4  ;;  %s3181_s4 = sld [smem:[#allocation36_spill]] }
  0x2a   : > { %3180 = sst [smem:[#allocation27_spill]] %s2612_s13  ;;  %s472_s19 = scalar_lea.vmem [#allocation6], %s2609_s24 }
  0x2b   : > { %s479_s22 = sshll.u32 %s472_s19, 4  ;;  %p2628_p7 = pnand %p3136_p5, %p167_p4  ;;  %s2624_s22 = int_to_ptr.vmem [resolvable:$true] %s479_s22 }
  0x2c   : > { %s2636_s11 = scalar_lea.sflag [#allocation7], %s3138_s23 }
  0x2d   : > { %s3182_s21 = scalar_select %p2628_p7, 1, 0 }
  0x2e   : > { %p2642_p11 = pneg %p2628_p7 }
  0x2f   : > { %s2621_s10 = scalar_lea.hbm %s3181_s4, %s2615_s15  ;;  %s2169_s27 = scalar_lea.hbm %s3181_s4, 32 }
  0x30   : > { %s2164_s12 = scalar_lea.hbm %s2621_s10, 16  ;;  %p2170_p2 = scmp.lt.u32.totalorder %s2621_s10, %s3181_s4 }
  0x31   : > { %p2165_p10 = scmp.ne.s32.totalorder %s2621_s10, %s2164_s12  ;;  %p2171_p4 = scmp.lt.u32.totalorder %s2169_s27, %s2164_s12 }
  0x32   : > { %p2173_p5 = scmp.lt.u32.totalorder %s2164_s12, %s2621_s10 }
  0x33   : > { %p2167_p12 = pnand %p2642_p11, %p2165_p10  ;;  %p2172_p6 = por %p2171_p4, %p2170_p2 }
  0x35   : > { %p2168_p13 = pneg %p2167_p12  ;;  %p2174_p3 = por %p2173_p5, %p2172_p6 }
  0x37   : > { %p2175_p0 = pnand %p2174_p3, %p2168_p13 }
  0x39   : > { %2178 = shalt.err (!%p2175_p0)
}
  0x3a   : > { %s2179_s23 = scalar_lea.vmem %s2624_s22, 16  ;;  %s2446_s13 = smov [#allocation6]  }
  0x3b   : > { %p2180_p10 = scmp.ne.s32.totalorder %s2624_s22, %s2179_s23  ;;  %s2184_s19 = sshll.u32 %s2446_s13, 4  ;;  %s2185_s19 = int_to_ptr.vmem [resolvable:$false] %s2184_s19 }
  0x3c   : > { %s2186_s7 = scalar_lea.vmem %s2185_s19, 32  ;;  %p2187_p9 = scmp.lt.s32.totalorder %s2624_s22, %s2185_s19 }
  0x3d   : > { %p2182_p12 = pnand %p2180_p10, %p2642_p11  ;;  %p2188_p1 = scmp.lt.s32.totalorder %s2186_s7, %s2179_s23 }
  0x3f   : > { %p2183_p8 = pneg %p2182_p12  ;;  %p2189_p2 = por %p2188_p1, %p2187_p9 }
  0x41   : > { %p2190_p4 = pnand %p2189_p2, %p2183_p8 }
  0x43   : > { %2193 = shalt.err (!%p2190_p4)
}
  0x44   : > { %2020 = dma.hbm_to_vmem [thread:$0]  (!%p2628_p7), %s2621_s10, 16, %s2624_s22, %s2636_s11  }
  0x45   : > { %p3184_p0 = scmp.lt.s32.totalorder %s2444_s18, 5  ;;  %p3185_p3 = scmp.ge.s32.totalorder %s2444_s18, 1 }
  0x46   : > { %s3187_s6 = sld [smem:[#allocation38_spill]]  ;;  %s506_s13 = scalar_lea.vmem [#allocation9], %s2609_s24 }
  0x47   : > { %p2670_p5 = pnand %p3185_p3, %p3184_p0  ;;  %s513_s19 = sshll.u32 %s506_s13, 4  ;;  %s514_s19 = int_to_ptr.vmem [resolvable:$true] %s513_s19 }
  0x48   : > { %s3188_s7 = sand.u32 1, %s2444_s18  }
  0x49   : > { %s3186_s9 = scalar_select %p2670_p5, 1, 0 }
  0x4a   : > { %s2683_s10 = scalar_lea.sflag [#allocation10], %s3188_s7 }
  0x4c   : > { %s2678_s12 = scalar_lea.hbm %s3187_s6, %s2615_s15  ;;  %s2199_s27 = scalar_lea.hbm %s3187_s6, 32 }
  0x4d   : > { %s2194_s22 = scalar_lea.hbm %s2678_s12, 16  ;;  %p2200_p13 = scmp.lt.u32.totalorder %s2678_s12, %s3187_s6 }
  0x4e   : > { %p2195_p1 = scmp.ne.s32.totalorder %s2678_s12, %s2194_s22  ;;  %p2201_p6 = scmp.lt.u32.totalorder %s2199_s27, %s2194_s22 }
  0x4f   : > { %p2203_p12 = scmp.lt.u32.totalorder %s2194_s22, %s2678_s12 }
  0x50   : > { %p2197_p8 = pnand %p2195_p1, %p2642_p11  ;;  %p2202_p10 = por %p2201_p6, %p2200_p13 }
  0x52   : > { %p2198_p9 = pneg %p2197_p8  ;;  %p2204_p2 = por %p2203_p12, %p2202_p10 }
  0x54   : > { %p2205_p4 = pnand %p2204_p2, %p2198_p9 }
  0x56   : > { %2208 = shalt.err (!%p2205_p4)
}
  0x57   : > { %s2209_s13 = scalar_lea.vmem %s514_s19, 16  ;;  %s2447_s7 = smov [#allocation9]  }
  0x58   : > { %p2210_p0 = scmp.ne.s32.totalorder %s514_s19, %s2209_s13  ;;  %s2214_s2 = sshll.u32 %s2447_s7, 4  ;;  %s2215_s2 = int_to_ptr.vmem [resolvable:$false] %s2214_s2 }
  0x59   : > { %s2216_s3 = scalar_lea.vmem %s2215_s2, 32  ;;  %p2217_p8 = scmp.lt.s32.totalorder %s514_s19, %s2215_s2 }
  0x5a   : > { %p2212_p3 = pnand %p2210_p0, %p2642_p11  ;;  %p2218_p5 = scmp.lt.s32.totalorder %s2216_s3, %s2209_s13 }
  0x5c   : > { %p2213_p1 = pneg %p2212_p3  ;;  %p2219_p7 = por %p2218_p5, %p2217_p8 }
  0x5e   : > { %p2220_p6 = pnand %p2219_p7, %p2213_p1 }
  0x60   : > { %2223 = shalt.err (!%p2220_p6)
}
  0x61   : > { %p3189_p13 = scmp.ne.s32.totalorder %s3182_s21, 0  ;;  %s2704_s1 = sadd.s32 4294967295, %s2444_s18  }
  0x62   : > { %s1828_s2 = sadd.s32 4294967294, %s2444_s18   ;;  %s47_s4 = sadd.s32 1, %s2440_s17 }
  0x63   : > { %2026 = dma.hbm_to_vmem [thread:$0]  (!%p3189_p13), %s2678_s12, 16, %s514_s19, %s2683_s10  }
  0x64   : > { %p3190_p7 = scmp.ne.s32.totalorder %s3178_s20, 0  ;;  %s54_s22 = sadd.s32 1, %s2424_s30 }
  0x65   : > { %p61_p5 = scmp.ne.s32.totalorder %s2424_s30, %s2420_s29  ;;  %p67_p10 = scmp.ne.s32.totalorder %s2420_s29, %s2416_s28 }
  0x66   : > { %s3250_s4 = smov (!%p3190_p7, %s47_s4), %s2440_s17  ;;  %p3191_p12 = scmp.eq.s32.totalorder %s2444_s18, 0 }
  0x67   : > { %p49_p9 = scmp.ge.s32.totalorder %s3250_s4, 2  ;;  %p68_p4 = scmp.eq.s32.totalorder %s2704_s1, 0 }
  0x68   : > { %p2718_p2 = por %p3191_p12, %p61_p5  ;;  %p3195_p3 = scmp.ne.s32.totalorder %s2408_s26, %s2404_s25 }
  0x69   : > { %s3252_s4 = smov (%p49_p9, %s3250_s4), 0  ;;  %p2728_p0 = por %p68_p4, %p67_p10 }
  0x6a   : > { %3193 = sst [smem:[#allocation28_spill]] %s3252_s4  ;;  %p2735_p1 = por %p3195_p3, %p68_p4 }
  0x6b   : > { %s3194_s20 = scalar_select %p2728_p0, 1, 0 }
  0x6c   : > { %s3196_s19 = scalar_select %p2735_p1, 1, 0 }
  0x6d   : > { %s51_s27 = ssub.s32 %s2440_s17, %s3252_s4  ;;  %p403_p8 = scmp.eq.s32.totalorder %s2704_s1, 3 }
  0x6e   : > { %3197 = sst [smem:[#allocation29_spill]] %s3196_s19  ;;  %p52_p6 = scmp.eq.s32.totalorder %s51_s27, 0 }
  0x6f   : > { %p409_p7 = scmp.eq.s32.totalorder %s1828_s2, 3  ;;  %p2742_p9 = por %p403_p8, %p61_p5 }
  0x70   : > { %s429_s13 = sand.u32 1, %s2424_s30   ;;  %s1832_s6 = sshll.u32 %s2440_s17, 7 }
  0x71   : > { %s3198_s23 = scalar_select %p2742_p9, 1, 0 }
  0x72   : > { %s2748_s7 = scalar_select %p52_p6, %s2424_s30, %s54_s22  }
  0x73   : > { %p2753_p12 = por %p409_p7, %p67_p10  ;;  %s1831_s25 = sshll.u32 %s429_s13, 3 }
  0x74   : > { %3199 = sst [smem:[#allocation30_spill]] %s2748_s7  ;;  %s3202_s0 = sld [smem:[#allocation32_spill]] }
  0x75   : > { %s3200_s3 = scalar_select %p2753_p12, 1, 0 }
  0x76   : > { %s433_s2 = scalar_lea.vmem [#allocation3], %s1831_s25  ;;  %p3203_p5 = scmp.lt.s32.totalorder %s2444_s18, 4 }
  0x77   : > { %3201 = sst [smem:[#allocation31_spill]] %s3200_s3  ;;  %s440_s27 = sshll.u32 %s433_s2, 4  ;;  %s2771_s27 = int_to_ptr.vmem [resolvable:$true] %s440_s27 }
  0x78   : > { %p2767_p4 = pnand %p3203_p5, %p2718_p2  ;;  %s3205_s5 = sld [smem:[#allocation37_spill]] }
  0x79   : > { %s430_s19 = scalar_lea.sflag [#allocation4], %s429_s13 }
  0x7a   : > { %s2761_s4 = scalar_lea.hbm %s3202_s0, %s1832_s6  ;;  %p2226_p3 = pneg %p2767_p4 }
  0x7b   : > { %s2224_s7 = scalar_lea.hbm %s2761_s4, 128  ;;  %s2229_s2 = scalar_lea.hbm %s3202_s0, 256 }
  0x7c   : > { %p2225_p10 = scmp.ne.s32.totalorder %s2761_s4, %s2224_s7  ;;  %p2230_p6 = scmp.lt.u32.totalorder %s2761_s4, %s3202_s0 }
  0x7d   : > { %p2231_p7 = scmp.lt.u32.totalorder %s2229_s2, %s2224_s7  ;;  %p2233_p12 = scmp.lt.u32.totalorder %s2224_s7, %s2761_s4 }
  0x7e   : > { %s2777_s6 = scalar_lea.hbm %s3205_s5, %s2615_s15  ;;  %p2227_p2 = pnand %p2226_p3, %p2225_p10 }
  0x7f   : > { %p2232_p5 = por %p2231_p7, %p2230_p6 }
  0x80   : > { %p2228_p8 = pneg %p2227_p2 }
  0x81   : > { %p2234_p9 = por %p2233_p12, %p2232_p5 }
  0x83   : > { %p2235_p1 = pnand %p2234_p9, %p2228_p8 }
  0x85   : > { %2238 = shalt.err (!%p2235_p1)
}
  0x86   : > { %s2239_s17 = scalar_lea.vmem %s2771_s27, 128  ;;  %s2448_s13 = smov [#allocation3]  }
  0x87   : > { %p2240_p10 = scmp.ne.s32.totalorder %s2771_s27, %s2239_s17  ;;  %s2244_s14 = sshll.u32 %s2448_s13, 4  ;;  %s2245_s14 = int_to_ptr.vmem [resolvable:$false] %s2244_s14 }
  0x88   : > { %s2246_s30 = scalar_lea.vmem %s2245_s14, 256  ;;  %p2247_p13 = scmp.lt.s32.totalorder %s2771_s27, %s2245_s14 }
  0x89   : > { %p2242_p2 = pnand %p2240_p10, %p2226_p3  ;;  %p2248_p6 = scmp.lt.s32.totalorder %s2246_s30, %s2239_s17 }
  0x8b   : > { %p2243_p0 = pneg %p2242_p2  ;;  %p2249_p7 = por %p2248_p6, %p2247_p13 }
  0x8d   : > { %p2250_p12 = pnand %p2249_p7, %p2243_p0 }
  0x8f   : > { %2253 = shalt.err (!%p2250_p12)
}
  0x90   : > { %2017 = dma.hbm_to_vmem [thread:$0]  (!%p2767_p4), %s2761_s4, 128, %s2771_s27, %s430_s19  }
  0x91   : > { %s489_s7 = scalar_lea.vmem [#allocation8], %s2609_s24  ;;  %s3206_s8 = sld [smem:[#allocation40_spill]] }
  0x92   : > { %s496_s3 = sshll.u32 %s489_s7, 4  ;;  %s2254_s17 = scalar_lea.hbm %s2777_s6, 16  ;;  %s497_s3 = int_to_ptr.vmem [resolvable:$true] %s496_s3 }
  0x93   : > { %p2255_p13 = scmp.ne.s32.totalorder %s2777_s6, %s2254_s17  ;;  %s2259_s14 = scalar_lea.hbm %s3205_s5, 32 }
  0x94   : > { %p2260_p9 = scmp.lt.u32.totalorder %s2777_s6, %s3205_s5  ;;  %p2261_p4 = scmp.lt.u32.totalorder %s2259_s14, %s2254_s17 }
  0x95   : > { %p2257_p0 = pnand %p2255_p13, %p2642_p11  ;;  %p2263_p8 = scmp.lt.u32.totalorder %s2254_s17, %s2777_s6 }
  0x96   : > { %p2262_p3 = por %p2261_p4, %p2260_p9 }
  0x97   : > { %s2809_s2 = scalar_lea.hbm %s3206_s8, %s2615_s15  ;;  %p2258_p1 = pneg %p2257_p0 }
  0x98   : > { %p2264_p5 = por %p2263_p8, %p2262_p3 }
  0x9a   : > { %p2265_p10 = pnand %p2264_p5, %p2258_p1 }
  0x9c   : > { %2268 = shalt.err (!%p2265_p10)
}
  0x9d   : > { %s2269_s15 = scalar_lea.vmem %s497_s3, 16  ;;  %s2449_s4 = smov [#allocation8]  }
  0x9e   : > { %p2270_p2 = scmp.ne.s32.totalorder %s497_s3, %s2269_s15  ;;  %s2274_s27 = sshll.u32 %s2449_s4, 4  ;;  %s2275_s27 = int_to_ptr.vmem [resolvable:$false] %s2274_s27 }
  0x9f   : > { %s2276_s19 = scalar_lea.vmem %s2275_s27, 32  ;;  %p2277_p12 = scmp.lt.s32.totalorder %s497_s3, %s2275_s27 }
  0xa0   : > { %p2272_p6 = pnand %p2270_p2, %p2642_p11  ;;  %p2278_p13 = scmp.lt.s32.totalorder %s2276_s19, %s2269_s15 }
  0xa2   : > { %p2273_p7 = pneg %p2272_p6  ;;  %p2279_p0 = por %p2278_p13, %p2277_p12 }
  0xa4   : > { %p2280_p4 = pnand %p2279_p0, %p2273_p7 }
  0xa6   : > { %2283 = shalt.err (!%p2280_p4)
}
  0xa7   : > { %p3207_p9 = scmp.ne.s32.totalorder %s3182_s21, 0  ;;  %s531_s0 = scalar_lea.vmem [#allocation11], %s2609_s24 }
  0xa8   : > { %s538_s7 = sshll.u32 %s531_s0, 4  ;;  %s2284_s12 = scalar_lea.hbm %s2809_s2, 16  ;;  %s539_s7 = int_to_ptr.vmem [resolvable:$true] %s538_s7 }
  0xa9   : > { %2023 = dma.hbm_to_vmem [thread:$0]  (!%p3207_p9), %s2777_s6, 16, %s497_s3, %s2636_s11  }
  0xaa   : > { %p2285_p1 = scmp.ne.s32.totalorder %s2809_s2, %s2284_s12  ;;  %s2289_s22 = scalar_lea.hbm %s3206_s8, 32 }
  0xab   : > { %p2290_p5 = scmp.lt.u32.totalorder %s2809_s2, %s3206_s8  ;;  %p2291_p10 = scmp.lt.u32.totalorder %s2289_s22, %s2284_s12 }
  0xac   : > { %p2287_p3 = pnand %p2285_p1, %p2642_p11  ;;  %p2293_p6 = scmp.lt.u32.totalorder %s2284_s12, %s2809_s2 }
  0xad   : > { %p2292_p2 = por %p2291_p10, %p2290_p5 }
  0xae   : > { %p2288_p8 = pneg %p2287_p3 }
  0xaf   : > { %p2294_p7 = por %p2293_p6, %p2292_p2 }
  0xb1   : > { %p2295_p12 = pnand %p2294_p7, %p2288_p8 }
  0xb3   : > { %2298 = shalt.err (!%p2295_p12)
}
  0xb4   : > { %s2299_s24 = scalar_lea.vmem %s539_s7, 16  ;;  %s2450_s11 = smov [#allocation11]  }
  0xb5   : > { %p2300_p13 = scmp.ne.s32.totalorder %s539_s7, %s2299_s24  ;;  %s2304_s6 = sshll.u32 %s2450_s11, 4  ;;  %s2305_s6 = int_to_ptr.vmem [resolvable:$false] %s2304_s6 }
  0xb6   : > { %s2306_s3 = scalar_lea.vmem %s2305_s6, 32  ;;  %p2307_p1 = scmp.lt.s32.totalorder %s539_s7, %s2305_s6 }
  0xb7   : > { %p2302_p0 = pnand %p2300_p13, %p2642_p11  ;;  %p2308_p3 = scmp.lt.s32.totalorder %s2306_s3, %s2299_s24 }
  0xb9   : > { %p2303_p4 = pneg %p2302_p0  ;;  %p2309_p9 = por %p2308_p3, %p2307_p1 }
  0xbb   : > { %p2310_p5 = pnand %p2309_p9, %p2303_p4 }
  0xbd   : > { %2313 = shalt.err (!%p2310_p5)
}
  0xbe   : > { %p3208_p10 = scmp.ne.s32.totalorder %s3182_s21, 0  ;;  %p3209_p8 = scmp.ne.s32.totalorder %s3186_s9, 0 }
  0xbf   : > { %s2851_s16 = sand.u32 (!%p3209_p8), 1, %s2420_s29   ;;  %p3210_p11 = scmp.ne.s32.totalorder (!%p3209_p8), %s3194_s20, 0 }
  0xc0   : > { %2029 = dma.hbm_to_vmem [thread:$0]  (!%p3208_p10), %s2809_s2, 16, %s539_s7, %s2683_s10  }
  0xc1   : > { %573 = sbr.rel (%p3209_p8) target bundleno = 2577 (0xa11), region = 72  ;;  %s1838_s30 = sshll.u32 (!%p3209_p8), %s2851_s16, 3 }
  0xc2   : > { %s576_s15 = scalar_lea.sflag (!%p3209_p8), [#allocation4], %s2851_s16  ;;  %s579_s4 = scalar_lea.vmem (!%p3209_p8), [#allocation3], %s1838_s30 }
  0xc8   : > { %2387 = dma.done.wait (%p3210_p11), %s576_s15, 128  }
  0xc9   : > { %2389 = vsyncadd (%p3210_p11), %s576_s15, 4294967168  ;;  %s3211_s21 = sld [smem:[#allocation29_spill]]  ;;  %s584_s10 = sand.u32 1, %s2704_s1  }
  0xca   : > { %s2861_s9 = sand.u32 1, %s2408_s26   ;;  %s585_s2 = scalar_lea.sflag [#allocation7], %s584_s10 }
  0xcf   : > { %p3212_p9 = scmp.ne.s32.totalorder %s3211_s21, 0 }
  0xd1   : > { %2391 = dma.done.wait (%p3212_p9), %s585_s2, 32  }
  0xd2   : > { %2393 = vsyncadd (%p3212_p9), %s585_s2, 4294967264  ;;  %s601_s20 = scalar_lea.sflag [#allocation10], %s584_s10 }
  0xd3   : > { %2395 = dma.done.wait (%p3212_p9), %s601_s20, 32  }
  0xd4   : > { %2397 = vsyncadd (%p3212_p9), %s601_s20, 4294967264  ;;  %s3213_s1 = sld [smem:[#allocation22_spill]]  ;;  %s3216_s21 = sld [smem:[#allocation35_spill]] }
  0xd5   : > { %s3215_s11 = sld [smem:[#allocation33_spill]]  ;;  %s3217_s0 = sld [smem:[#allocation39_spill]] }
  0xd6   : > { %s3218_s29 = sld [smem:[#allocation41_spill]]  ;;  %s3219_s14 = sld [smem:[#allocation42_spill]] }
  0xd7   : > { %s3220_s3 = sld [smem:[#allocation43_spill]]  ;;  %s3221_s28 = sld [smem:[#allocation44_spill]] }
  0xda   : > { %p702_p2 = scmp.lt.s32.totalorder %s3213_s1, 1  ;;  %p1848_p6 = scmp.ne.s32.totalorder %s3213_s1, 0 }
  0xdb   : > { %v739_v0 = vld [vmem:[%s579_s4] sm:$0xff] (!%p1848_p6)  ;;  %vm740_vm0 = vcmask (!%p1848_p6), 261120  }
  0xdc   : > { %s2876_s7 = scalar_select %p702_p2, %s3213_s1, 1 }
  0xdd   : > { %738 = sbr.rel (%p1848_p6) target bundleno = 228 (0xe4), region = 96  ;;  %741 = vst.msk [vmem:[#allocation2] sm:$0xff] (!%p1848_p6), %vm740_vm0, %v739_v0 }
  0xde   : > { %s1884_s12 = sshll.u32 %s2876_s7, 4  ;;  %s1887_s27 = sshll.u32 %s2876_s7, 5 }
  0xdf   : > { %s706_s6 = scalar_lea.vmem %s3215_s11, %s1884_s12  ;;  %s2889_s10 = scalar_lea.vmem %s3216_s21, %s1884_s12 }
  0xe0   : > { %s2894_s19 = scalar_lea.vmem %s3217_s0, %s1884_s12  ;;  %s2900_s25 = scalar_lea.vmem %s3218_s29, %s1887_s27 }
  0xe1   : > { %s727_s24 = scalar_lea.vmem %s3219_s14, %s2876_s7  ;;  %s730_s15 = scalar_lea.vmem %s3220_s3, %s2876_s7 }
  0xe2   : > { %s733_s2 = scalar_lea.vmem %s3221_s28, %s2876_s7  ;;  %s611_s0 = scalar_lea.vmem [#allocation11], %s2861_s9 }
  0xe3   : > { %s2915_s12 = scalar_lea.vmem [#allocation12], %s1838_s30 }
  0xe4 PF: > { %v2134_v1 = vld [vmem:[%s706_s6] sm:$0xff]   ;;  %v2451_v2 = vmov 0.0   ;;  %v2135_v3 = vld [vmem:[%s706_s6 + $0x8] sm:$0xff]   ;;  %vm2452_vm1 = vmmov 0   ;;  %vm767_vm2 = vcmask 261120   ;;  %s3222_s26 = sld [smem:[#allocation34_spill]] }
  0xe5   : > { %1918 = vmatprep.subr.bf16.mxu0 %v2451_v2  ;;  %1926 = vmatprep.subr.bf16.mxu1 %v2451_v2  ;;  %v2922_v4 = vld [vmem:[#allocation2] sm:$0xff]  ;;  %s2453_s29 = smov 104   ;;  %s2454_s30 = smov 120   ;;  %vm828_vm3 = vcmask 64512   ;;  %vm1079_vm4 = vcmask 1043456   ;;  %vm1280_vm5 = vcmask 130048  }
  0xe6   : > { %1919 = vmatpush3.bf16.msra.mxu0 %v2134_v1  ;;  %1922 = vmatprep.mubr.msk.bf16.mxu0 %vm2452_vm1, %v2451_v2  ;;  %v743_v5 = vpack.c.bf16 %v2922_v4, %v2922_v4  ;;  %s2455_s4 = smov 112   ;;  %s2456_s27 = smov 96   ;;  %vm1282_vm6 = vcmask 195584   ;;  %vm1492_vm7 = vcmask 523264  }
  0xe7   : > { %1920 = vmatprep.subr.bf16.mxu0 %v2451_v2  ;;  %1928 = vmatprep.mubr.msk.bf16.mxu1 %vm2452_vm1, %v2451_v2  ;;  %s2457_s1 = smov 64   ;;  %s2458_s13 = smov 8  }
  0xe8   : > { %s2459_s6 = smov 16   ;;  %s2460_s20 = smov 24  }
  0xe9   : > { %s3226_s17 = scalar_lea.vmem [#allocation9], %s2861_s9  ;;  %s3230_s5 = sld [smem:[#allocation22_spill]] }
  0xea   : > { %1921 = vmatpush3.bf16.msra.mxu0 %v2135_v3  ;;  %s3223_s28 = scalar_lea.vmem %s3222_s26, %s2876_s7 }
  0xeb   : > { %1932 = vmatprep.subr.bf16.mxu0 %v2451_v2  ;;  %v1849_v6 = vld [vmem:[%s3223_s28] ss:$0 sm:$0xff] }
  0xed   : > { %1923 = vmatmul.mubr.msk.bf16.vlgmr.msra.gmra.mrb[0].mxu0 %vm767_vm2, %v743_v5 }
  0xee   : > { %1934 = vmatprep.mubr.msk.bf16.mxu0 %vm2452_vm1, %v2451_v2 }
  0xef   : > { %p1879_p7 = scmp.ne.s32.totalorder %s3230_s5, 1 }
 0x1c0   : > { %v805_v7 = vpop.f32.mrb[0].mxu0 }
 0x1c1   : > { %v806_v8 = vadd.f32 %v1849_v6, %v805_v7  ;;  %v1924_v9 = vpop.f32.mrb[1].mxu0 }
 0x1c2   : > { %v808_v10 = vpop.f32.mrb[2].mxu0 }
 0x1c3   : > { %818 = vrot.lane.b32.xlu1 %v806_v8, %s2453_s29  ;;  %812 = vrot.lane.b32.xlu0 %v806_v8, %s2454_s30  ;;  %v1925_v11 = vpop.f32.mrb[3].mxu0  ;;  %v2938_v12 = vpack.c.bf16 %v806_v8, %v806_v8 }
 0x1c7   : > { %815 = vrot.lane.b32.xlu0 %v806_v8, %s2455_s4  ;;  %826 = vrot.lane.b32.xlu1 %v2938_v12, %s2456_s27 }
 0x235   : > { %v819_v13 = vpop.permute.xlu1 %818  ;;  %v813_v14 = vpop.permute.xlu0 %812 }
 0x236   : > { %v822_v15 = vpack.c.bf16 %v813_v14, %v813_v14  ;;  %v2941_v18 = vpack.c.bf16 %v819_v13, %v819_v13 }
 0x238   : > { %876 = vrot.lane.b32.xlu0 %v822_v15, %s2456_s27 }
 0x239   : > { %v816_v16 = vpop.permute.xlu0 %815  ;;  %v827_v17 = vpop.permute.xlu1 %826 }
 0x23a   : > { %v2943_v19 = vpack.c.bf16 %v816_v16, %v816_v16  ;;  %v833_v20 = vsel %vm828_vm3, %v827_v17, 0 }
 0x23b   : > { %1927 = vmatpush3.bf16.xpose.msra.mxu1 %v833_v20 }
 0x23c   : > { %974 = vrot.lane.b32.xlu0 %v2941_v18, %s2456_s27  ;;  %925 = vrot.lane.b32.xlu1 %v2943_v19, %s2456_s27 }
 0x23d   : > { %1938 = vmatprep.subr.bf16.mxu1 %v2451_v2 }
 0x242   : > { %1929 = vmatmul.mubr.msk.bf16.vlgmr.msra.gmra.mrb[0].mxu1 %vm828_vm3, %v2938_v12 }
 0x243   : > { %1940 = vmatprep.mubr.msk.bf16.mxu1 %vm2452_vm1, %v2451_v2 }
 0x2aa   : > { %v877_v21 = vpop.permute.xlu0 %876 }
 0x2ab   : > { %v882_v22 = vsel %vm828_vm3, %v877_v21, 0 }
 0x2ac   : > { %1933 = vmatpush3.bf16.xpose.msra.mxu0 %v882_v22 }
 0x2ad   : > { %1944 = vmatprep.subr.bf16.mxu0 %v2451_v2 }
 0x2ae   : > { %v926_v23 = vpop.permute.xlu1 %925  ;;  %v975_v25 = vpop.permute.xlu0 %974 }
 0x2af   : > { %v931_v24 = vsel %vm828_vm3, %v926_v23, 0  ;;  %v980_v26 = vsel %vm828_vm3, %v975_v25, 0 }
 0x2b0   : > { %1939 = vmatpush3.bf16.xpose.msra.mxu1 %v931_v24 }
 0x2b1   : > { %1950 = vmatprep.subr.bf16.mxu1 %v2451_v2 }
 0x2b3   : > { %1935 = vmatmul.mubr.msk.bf16.vlgmr.msra.gmra.mrb[4].mxu0 %vm828_vm3, %v822_v15 }
 0x2b4   : > { %1945 = vmatpush3.bf16.xpose.msra.mxu0 %v980_v26  ;;  %1946 = vmatprep.mubr.msk.bf16.mxu0 %vm2452_vm1, %v2451_v2 }
 0x2b5   : > { %1956 = vmatprep.subr.bf16.mxu0 %v2451_v2 }
 0x2b7   : > { %1941 = vmatmul.mubr.msk.bf16.vlgmr.msra.gmra.mrb[4].mxu1 %vm828_vm3, %v2943_v19 }
 0x2b8   : > { %1952 = vmatprep.mubr.msk.bf16.mxu1 %vm2452_vm1, %v2451_v2 }
 0x2bb   : > { %1947 = vmatmul.mubr.msk.bf16.vlgmr.msra.gmra.mrb[8].mxu0 %vm828_vm3, %v2941_v18 }
 0x2bc   : > { %1958 = vmatprep.mubr.msk.bf16.mxu0 %vm2452_vm1, %v2451_v2 }
 0x315   : > { %v869_v27 = vpop.f32.mrb[0].mxu1 }
 0x316   : > { %v1022_v28 = vmul.f32 0.35355338, %v869_v27  ;;  %v1930_v29 = vpop.f32.mrb[1].mxu1 }
 0x317   : > { %v872_v30 = vpop.f32.mrb[2].mxu1 }
 0x318   : > { %v1931_v31 = vpop.f32.mrb[3].mxu1  ;;  %v1026_v32 = vsel %vm828_vm3, %v1022_v28, -inf }
 0x319   : > { %1027 = vmax.xlane.f32.xlu1 %v1026_v32 }
 0x386   : > { %v918_v33 = vpop.f32.mrb[4].mxu0 }
 0x387   : > { %v1023_v34 = vmul.f32 0.35355338, %v918_v33  ;;  %v1936_v35 = vpop.f32.mrb[5].mxu0 }
 0x388   : > { %v921_v36 = vpop.f32.mrb[6].mxu0 }
 0x389   : > { %v1937_v37 = vpop.f32.mrb[7].mxu0  ;;  %v1029_v38 = vsel %vm828_vm3, %v1023_v34, -inf }
 0x38a   : > { %v967_v39 = vpop.f32.mrb[4].mxu1  ;;  %1030 = vmax.xlane.f32.xlu0 %v1029_v38  ;;  %v2136_v37 = vld [vmem:[%s2889_s10] sm:$0xff]   ;;  %v2137_v38 = vld [vmem:[%s2889_s10 + $0x8] sm:$0xff]   ;;  %s3224_s10 = scalar_lea.vmem [#allocation6], %s2861_s9 }
 0x38b   : > { %v1024_v40 = vmul.f32 0.35355338, %v967_v39  ;;  %v1942_v41 = vpop.f32.mrb[5].mxu1 }
 0x38c   : > { %v970_v42 = vpop.f32.mrb[6].mxu1 }
 0x38d   : > { %v1943_v43 = vpop.f32.mrb[7].mxu1  ;;  %v1032_v44 = vsel %vm828_vm3, %v1024_v40, -inf }
 0x38e   : > { %1033 = vmax.xlane.f32.xlu0 %v1032_v44  ;;  %v1016_v45 = vpop.f32.mrb[8].mxu0 }
 0x38f   : > { %v1025_v46 = vmul.f32 0.35355338, %v1016_v45  ;;  %v1948_v47 = vpop.f32.mrb[9].mxu0 }
 0x390   : > { %v1019_v48 = vpop.f32.mrb[10].mxu0 }
 0x391   : > { %v1949_v49 = vpop.f32.mrb[11].mxu0  ;;  %v1035_v50 = vsel %vm828_vm3, %v1025_v46, -inf }
 0x392   : > { %1036 = vmax.xlane.f32.xlu1 %v1035_v50 }
 0x3a3   : > { %1123 = vrot.lane.b32.xlu1 %v822_v15, %s2457_s1 }
 0x3a4   : > { %1074 = vrot.lane.b32.xlu0 %v2938_v12, %s2457_s1 }
 0x3a6   : > { %v1028_v51 = vpop.xlane.xlu1 %1027 }
 0x3a7   : > { %v1038_v52 = vsub.f32 %v1022_v28, %v1028_v51 }
 0x3a9   : > { %v1042_v53 = vmul.f32 1.442695, %v1038_v52 }
 0x3ab   : > { %2144 = vpow2.f32 %v1042_v53 }
 0x3b5   : > { %v2145_v54 = vpop.eup %2144 }
 0x3b6   : > { %v1050_v55 = vsel %vm828_vm3, %v2145_v54, 0.0 }
 0x3c3   : > { %1051 = vadd.xlane.f32.xlu0 %v1050_v55 }
 0x417   : > { %v1031_v56 = vpop.xlane.xlu0 %1030 }
 0x418   : > { %v1039_v57 = vsub.f32 %v1023_v34, %v1031_v56 }
 0x41a   : > { %v1044_v58 = vmul.f32 1.442695, %v1039_v57 }
 0x41b   : > { %v1034_v59 = vpop.xlane.xlu0 %1033 }
 0x41c   : > { %2146 = vpow2.f32 %v1044_v58  ;;  %v1040_v60 = vsub.f32 %v1024_v40, %v1034_v59  ;;  %v1861_v58 = vld [vmem:[%s3224_s10] ss:$0 sm:$0xff] }
 0x41e   : > { %v1046_v61 = vmul.f32 1.442695, %v1040_v60 }
 0x41f   : > { %v1075_v62 = vpop.permute.xlu0 %1074  ;;  %v1037_v63 = vpop.xlane.xlu1 %1036 }
 0x420   : > { %2148 = vpow2.f32 %v1046_v61  ;;  %v1081_v0 = vsel %vm1079_vm4, %v1075_v62, 0  ;;  %v1041_v1 = vsub.f32 %v1025_v46, %v1037_v63 }
 0x421   : > { %1951 = vmatpush3.bf16.msra.mxu1 %v1081_v0 }
 0x422   : > { %v1048_v3 = vmul.f32 1.442695, %v1041_v1  ;;  %1962 = vmatprep.subr.bf16.mxu1 %v2451_v2 }
 0x423   : > { %v1124_v5 = vpop.permute.xlu1 %1123 }
 0x424   : > { %2150 = vpow2.f32 %v1048_v3  ;;  %v1129_v6 = vsel %vm1079_vm4, %v1124_v5, 0 }
 0x425   : > { %1957 = vmatpush3.bf16.msra.mxu0 %v1129_v6  ;;  %v2138_v6 = vld [vmem:[%s2894_s19] sm:$0xff]  }
 0x426   : > { %v2147_v7 = vpop.eup %2146  ;;  %1968 = vmatprep.subr.bf16.mxu0 %v2451_v2 }
 0x427   : > { %v1053_v8 = vsel %vm828_vm3, %v2147_v7, 0.0 }
 0x428   : > { %1054 = vadd.xlane.f32.xlu1 %v1053_v8  ;;  %v2140_v8 = vld [vmem:[%s2900_s25] sm:$0xff]  }
 0x42a   : > { %v2149_v9 = vpop.eup %2148 }
 0x42b   : > { %v1056_v10 = vsel %vm828_vm3, %v2149_v9, 0.0 }
 0x42c   : > { %1057 = vadd.xlane.f32.xlu0 %v1056_v10 }
 0x42e   : > { %v2151_v11 = vpop.eup %2150 }
 0x42f   : > { %v1059_v12 = vsel %vm828_vm3, %v2151_v11, 0.0 }
 0x430   : > { %1060 = vadd.xlane.f32.xlu1 %v1059_v12 }
 0x441   : > { %1171 = vrot.lane.b32.xlu1 %v2943_v19, %s2457_s1 }
 0x442   : > { %1219 = vrot.lane.b32.xlu0 %v2941_v18, %s2457_s1 }
 0x450   : > { %v1052_v13 = vpop.xlane.xlu0 %1051 }
 0x451   : > { %2152 = vrcp.f32 %v1052_v13 }
 0x45b   : > { %v2153_v14 = vpop.eup %2152 }
 0x45c   : > { %v1066_v15 = vmul.f32 %v2153_v14, %v2145_v54 }
 0x45e   : > { %v1070_v16 = vpack.c.bf16 %v1066_v15, %v1066_v15 }
 0x460   : > { %1953 = vmatmul.mubr.msk.bf16.vlgmr.msra.gmra.mrb[8].mxu1 %vm828_vm3, %v1070_v16 }
 0x461   : > { %1964 = vmatprep.mubr.msk.bf16.mxu1 %vm2452_vm1, %v2451_v2 }
 0x4b5   : > { %v1055_v17 = vpop.xlane.xlu1 %1054 }
 0x4b6   : > { %2154 = vrcp.f32 %v1055_v17 }
 0x4b9   : > { %v1058_v20 = vpop.xlane.xlu0 %1057 }
 0x4ba   : > { %2156 = vrcp.f32 %v1058_v20 }
 0x4bd   : > { %v1061_v21 = vpop.xlane.xlu1 %1060  ;;  %v1220_v18 = vpop.permute.xlu0 %1219 }
 0x4be   : > { %2158 = vrcp.f32 %v1061_v21  ;;  %v1225_v28 = vsel %vm1079_vm4, %v1220_v18, 0 }
 0x4c0   : > { %v2155_v19 = vpop.eup %2154 }
 0x4c1   : > { %v1067_v22 = vmul.f32 %v2155_v19, %v2147_v7  ;;  %v1172_v23 = vpop.permute.xlu1 %1171  ;;  %v2139_v7 = vld [vmem:[%s2894_s19 + $0x8] sm:$0xff]   ;;  %s3225_s19 = scalar_lea.vmem [#allocation8], %s2861_s9  ;;  %v1866_v19 = vld [vmem:[%s3226_s17] ss:$0 sm:$0xff] }
 0x4c2   : > { %v1177_v24 = vsel %vm1079_vm4, %v1172_v23, 0  ;;  %v1865_v20 = vld [vmem:[%s3225_s19] ss:$0 sm:$0xff] }
 0x4c3   : > { %1963 = vmatpush3.bf16.msra.mxu1 %v1177_v24  ;;  %v1071_v25 = vpack.c.bf16 %v1067_v22, %v1067_v22  ;;  %v2142_v24 = vld [vmem:[%s2900_s25 + $0x10] sm:$0xff]  }
 0x4c4   : > { %v2157_v26 = vpop.eup %2156  ;;  %1974 = vmatprep.subr.bf16.mxu1 %v2451_v2 }
 0x4c5   : > { %v1068_v27 = vmul.f32 %v2157_v26, %v2149_v9  ;;  %1959 = vmatmul.mubr.msk.bf16.vlgmr.msra.gmra.mrb[12].mxu0 %vm828_vm3, %v1071_v25  ;;  %v2141_v9 = vld [vmem:[%s2900_s25 + $0x8] sm:$0xff]   ;;  %v2143_v25 = vld [vmem:[%s2900_s25 + $0x18] sm:$0xff]   ;;  %v1867_v26 = vld [vmem:[%s611_s0] ss:$0 sm:$0xff] }
 0x4c6   : > { %1969 = vmatpush3.bf16.msra.mxu0 %v1225_v28  ;;  %1970 = vmatprep.mubr.msk.bf16.mxu0 %vm2452_vm1, %v2451_v2 }
 0x4c7   : > { %v1072_v29 = vpack.c.bf16 %v1068_v27, %v1068_v27  ;;  %1982 = vmatprep.subr.bf16.mxu0 %v2451_v2 }
 0x4c8   : > { %v2159_v30 = vpop.eup %2158 }
 0x4c9   : > { %v1069_v31 = vmul.f32 %v2159_v30, %v2151_v11  ;;  %1965 = vmatmul.mubr.msk.bf16.vlgmr.msra.gmra.mrb[12].mxu1 %vm828_vm3, %v1072_v29 }
 0x4ca   : > { %1978 = vmatprep.mubr.msk.bf16.mxu1 %vm2452_vm1, %v2451_v2  ;;  %1975 = vmatpush3.bf16.msra.mxu1 %v2136_v37 }
 0x4cb   : > { %v1073_v32 = vpack.c.bf16 %v1069_v31, %v1069_v31  ;;  %1976 = vmatprep.subr.bf16.mxu1 %v2451_v2 }
 0x4cd   : > { %1971 = vmatmul.mubr.msk.bf16.vlgmr.msra.gmra.mrb[16].mxu0 %vm828_vm3, %v1073_v32 }
 0x4ce   : > { %1986 = vmatprep.mubr.msk.bf16.mxu0 %vm2452_vm1, %v2451_v2  ;;  %1977 = vmatpush3.bf16.msra.mxu1 %v2137_v38 }
 0x4cf   : > { %1990 = vmatprep.subr.bf16.mxu1 %v2451_v2  ;;  %1983 = vmatpush3.bf16.msra.mxu0 %v2138_v6 }
 0x4d0   : > { %1984 = vmatprep.subr.bf16.mxu0 %v2451_v2 }
 0x4d3   : > { %1985 = vmatpush3.bf16.msra.mxu0 %v2139_v7 }
 0x533   : > { %v1117_v33 = vpop.f32.mrb[8].mxu1 }
 0x534   : > { %v1954_v34 = vpop.f32.mrb[9].mxu1 }
 0x535   : > { %v1120_v35 = vpop.f32.mrb[10].mxu1  ;;  %v1871_v34 = vld [vmem:[%s727_s24] ss:$0 sm:$0xff] }
 0x536   : > { %v1955_v36 = vpop.f32.mrb[11].mxu1 }
 0x598   : > { %v1165_v39 = vpop.f32.mrb[12].mxu0 }
 0x599   : > { %1268 = vrot.lane.b32.xlu1 %v1165_v39, %s2458_s13  ;;  %v1960_v40 = vpop.f32.mrb[13].mxu0 }
 0x59a   : > { %v1168_v41 = vpop.f32.mrb[14].mxu0 }
 0x59b   : > { %v1961_v42 = vpop.f32.mrb[15].mxu0 }
 0x59c   : > { %v1213_v43 = vpop.f32.mrb[12].mxu1 }
 0x59d   : > { %1272 = vrot.lane.b32.xlu0 %v1213_v43, %s2459_s6  ;;  %v1966_v44 = vpop.f32.mrb[13].mxu1 }
 0x59e   : > { %v1216_v45 = vpop.f32.mrb[14].mxu1 }
 0x59f   : > { %v1967_v46 = vpop.f32.mrb[15].mxu1 }
 0x5a0   : > { %v1261_v47 = vpop.f32.mrb[16].mxu0 }
 0x5a1   : > { %1276 = vrot.lane.b32.xlu1 %v1261_v47, %s2460_s20  ;;  %v1972_v48 = vpop.f32.mrb[17].mxu0 }
 0x5a2   : > { %v1264_v49 = vpop.f32.mrb[18].mxu0 }
 0x5a3   : > { %v1973_v50 = vpop.f32.mrb[19].mxu0 }
 0x60b   : > { %v1269_v51 = vpop.permute.xlu1 %1268 }
 0x60c   : > { %v1279_v53 = vsel %vm828_vm3, %v1117_v33, %v1269_v51 }
 0x60f   : > { %v1273_v52 = vpop.permute.xlu0 %1272 }
 0x610   : > { %v1281_v54 = vsel %vm1280_vm5, %v1279_v53, %v1273_v52  ;;  %v1877_v52 = vld [vmem:[%s730_s15] ss:$0 sm:$0xff] }
 0x613   : > { %v1277_v55 = vpop.permute.xlu1 %1276 }
 0x614   : > { %v1283_v56 = vsel %vm1282_vm6, %v1281_v54, %v1277_v55  ;;  %v1878_v54 = vld [vmem:[%s733_s2] ss:$0 sm:$0xff] }
 0x615   : > { %v1284_v57 = vpack.c.bf16 %v1283_v56, %v1283_v56 }
 0x617   : > { %1979 = vmatmul.mubr.msk.bf16.vlgmr.msra.gmra.mrb[16].mxu1 %vm767_vm2, %v1284_v57 }
 0x618   : > { %1998 = vmatprep.mubr.msk.bf16.mxu1 %vm2452_vm1, %v2451_v2  ;;  %1991 = vmatpush3.bf16.msra.mxu1 %v2140_v8 }
 0x619   : > { %1992 = vmatprep.subr.bf16.mxu1 %v2451_v2 }
 0x61c   : > { %1993 = vmatpush3.bf16.msra.mxu1 %v2141_v9 }
 0x61d   : > { %1994 = vmatprep.subr.bf16.mxu1 %v2451_v2 }
 0x620   : > { %1995 = vmatpush3.bf16.msra.mxu1 %v2142_v24 }
 0x621   : > { %1996 = vmatprep.subr.bf16.mxu1 %v2451_v2 }
 0x624   : > { %1997 = vmatpush3.bf16.msra.mxu1 %v2143_v25 }
 0x6ea   : > { %v1345_v59 = vpop.f32.mrb[16].mxu1 }
 0x6eb   : > { %v1346_v60 = vadd.f32 %v1861_v58, %v1345_v59  ;;  %v1980_v61 = vpop.f32.mrb[17].mxu1 }
 0x6ec   : > { %v1348_v62 = vpop.f32.mrb[18].mxu1 }
 0x6ed   : > { %v1351_v63 = vadd.f32 %v1346_v60, %v2922_v4  ;;  %v1981_v0 = vpop.f32.mrb[19].mxu1 }
 0x6ef   : > { %v1354_v1 = vsel %vm767_vm2, %v1351_v63, 0.0  ;;  %v1359_v3 = vmul.f32 %v1351_v63, %v1351_v63 }
 0x6f0   : > { %1355 = vadd.xlane.f32.xlu0 %v1354_v1 }
 0x6f1   : > { %v1360_v5 = vsel %vm767_vm2, %v1359_v3, 0.0 }
 0x6f2   : > { %1361 = vadd.xlane.f32.xlu1 %v1360_v5 }
 0x77d   : > { %v1356_v4 = vpop.xlane.xlu0 %1355 }
 0x77e   : > { %v1358_v10 = vmul.f32 0.03125, %v1356_v4 }
 0x77f   : > { %v1362_v11 = vpop.xlane.xlu1 %1361 }
 0x780   : > { %v1364_v12 = vmul.f32 %v1358_v10, %v1358_v10  ;;  %v1363_v13 = vmul.f32 0.03125, %v1362_v11  ;;  %v1366_v16 = vsub.f32 %v1351_v63, %v1358_v10 }
 0x782   : > { %v1365_v14 = vsub.f32 %v1363_v13, %v1364_v12 }
 0x784   : > { %v1367_v15 = vadd.f32 1e-05, %v1365_v14 }
 0x786   : > { %2160 = vrsqrt.f32 %v1367_v15 }
 0x790   : > { %v2161_v17 = vpop.eup %2160 }
 0x791   : > { %v1369_v21 = vmul.f32 %v2161_v17, %v1366_v16 }
 0x793   : > { %v1376_v22 = vmul.f32 %v1865_v20, %v1369_v21 }
 0x795   : > { %v1383_v23 = vadd.f32 %v1866_v19, %v1376_v22 }
 0x797   : > { %v1384_v18 = vpack.c.bf16 %v1383_v23, %v1383_v23 }
 0x799   : > { %1987 = vmatmul.mubr.msk.bf16.vlgmr.msra.gmra.mrb[20].mxu0 %vm767_vm2, %v1384_v18 }
 0x86c   : > { %v1445_v27 = vpop.f32.mrb[20].mxu0 }
 0x86d   : > { %v1446_v28 = vadd.f32 %v1867_v26, %v1445_v27  ;;  %v1988_v29 = vpop.f32.mrb[21].mxu0 }
 0x86e   : > { %v1448_v30 = vpop.f32.mrb[22].mxu0 }
 0x86f   : > { %v1451_v31 = vmax.f32 %v1446_v28, 0.0  ;;  %v1989_v32 = vpop.f32.mrb[23].mxu0 }
 0x871   : > { %v1452_v33 = vpack.c.bf16 %v1451_v31, %v1451_v31 }
 0x873   : > { %1999 = vmatmul.mubr.msk.bf16.vlgmr.msra.gmra.mrb[20].mxu1 %vm1492_vm7, %v1452_v33 }
 0x946   : > { %v1530_v35 = vpop.f32.mrb[20].mxu1 }
 0x947   : > { %v1531_v2 = vadd.f32 %v1871_v34, %v1530_v35  ;;  %v2000_v36 = vpop.f32.mrb[21].mxu1 }
 0x948   : > { %v1533_v37 = vpop.f32.mrb[22].mxu1 }
 0x949   : > { %v1536_v38 = vadd.f32 %v1531_v2, %v1383_v23  ;;  %v2001_v39 = vpop.f32.mrb[23].mxu1 }
 0x94b   : > { %v1539_v40 = vsel %vm767_vm2, %v1536_v38, 0.0  ;;  %v1543_v41 = vmul.f32 %v1536_v38, %v1536_v38 }
 0x94c   : > { %1540 = vadd.xlane.f32.xlu0 %v1539_v40 }
 0x94d   : > { %v1544_v42 = vsel %vm767_vm2, %v1543_v41, 0.0 }
 0x950   : > { %1545 = vadd.xlane.f32.xlu0 %v1544_v42 }
 0x9d9   : > { %v1541_v43 = vpop.xlane.xlu0 %1540 }
 0x9da   : > { %v1542_v44 = vmul.f32 0.03125, %v1541_v43 }
 0x9dc   : > { %v1548_v46 = vmul.f32 %v1542_v44, %v1542_v44  ;;  %v1550_v50 = vsub.f32 %v1536_v38, %v1542_v44 }
 0x9dd   : > { %v1546_v45 = vpop.xlane.xlu0 %1545 }
 0x9de   : > { %v1547_v47 = vmul.f32 0.03125, %v1546_v45 }
 0x9e0   : > { %v1549_v48 = vsub.f32 %v1547_v47, %v1548_v46 }
 0x9e2   : > { %v1551_v49 = vadd.f32 1e-05, %v1549_v48 }
 0x9e4   : > { %2162 = vrsqrt.f32 %v1551_v49 }
 0x9ee   : > { %v2163_v51 = vpop.eup %2162 }
 0x9ef   : > { %v1553_v53 = vmul.f32 %v2163_v51, %v1550_v50  ;;  %1572 = sbr.rel (%p1879_p7) target bundleno = 2550 (0x9f6), region = 100 }
 0x9f1   : > { %v1560_v55 = vmul.f32 %v1877_v52, %v1553_v53 }
 0x9f3   : > { %v1567_v56 = vadd.f32 %v1878_v54, %v1560_v55 }
 0x9f5   : > { %1568 = vst.msk [vmem:[#allocation2] sm:$0xff] %vm767_vm2, %v1567_v56  ;;  %1573 = vst.msk [vmem:[%s2915_s12] sm:$0xff] (!%p1879_p7), %vm767_vm2, %v1567_v56 }
 0x9f6 PF: > { %s3231_s8 = sld [smem:[#allocation23_spill]]  ;;  %s3232_s7 = sld [smem:[#allocation45_spill]] }
 0x9f7   : > { %s1588_s29 = sshll.u32 %s2915_s12, 4  ;;  %s1575_s30 = scalar_lea.sflag [#allocation5], %s2851_s16  ;;  %s1589_s29 = int_to_ptr.vmem [resolvable:$true] %s1588_s29 }
 0x9f8   : > { %s2314_s4 = scalar_lea.vmem %s1589_s29, 128  ;;  %p3233_p13 = scmp.ne.s32.totalorder %s3198_s23, 0 }
 0x9f9   : > { %p2315_p12 = scmp.ne.s32.totalorder %s1589_s29, %s2314_s4  ;;  %s2461_s27 = smov [#allocation12]  }
 0x9fa   : > { %s2318_s1 = sshll.u32 %s2461_s27, 4  ;;  %s2319_s1 = int_to_ptr.vmem [resolvable:$false] %s2318_s1 }
 0x9fb   : > { %p2316_p0 = pnand %p2315_p12, %p3233_p13  ;;  %s2320_s13 = scalar_lea.vmem %s2319_s1, 256 }
 0x9fc   : > { %s1881_s15 = sshll.u32 %s3231_s8, 7  ;;  %p2321_p1 = scmp.lt.s32.totalorder %s1589_s29, %s2319_s1 }
 0x9fd   : > { %s3060_s2 = scalar_lea.hbm %s3232_s7, %s1881_s15  ;;  %p2317_p4 = pneg %p2316_p0 }
 0x9fe   : > { %p2322_p3 = scmp.lt.s32.totalorder %s2320_s13, %s2314_s4 }
 0xa00   : > { %p2323_p5 = por %p2322_p3, %p2321_p1 }
 0xa02   : > { %p2324_p10 = pnand %p2323_p5, %p2317_p4 }
 0xa04   : > { %2327 = shalt.err (!%p2324_p10)
}
 0xa05   : > { %s2328_s16 = scalar_lea.hbm %s3060_s2, 128  ;;  %s2332_s20 = scalar_lea.hbm %s3232_s7, 256 }
 0xa06   : > { %p2329_p8 = scmp.ne.s32.totalorder %s3060_s2, %s2328_s16  ;;  %p2333_p2 = scmp.lt.u32.totalorder %s3060_s2, %s3232_s7 }
 0xa07   : > { %p2334_p6 = scmp.lt.u32.totalorder %s2332_s20, %s2328_s16  ;;  %p2336_p12 = scmp.lt.u32.totalorder %s2328_s16, %s3060_s2 }
 0xa08   : > { %p2330_p11 = pnand %p2329_p8, %p3233_p13 }
 0xa09   : > { %p2335_p7 = por %p2334_p6, %p2333_p2 }
 0xa0a   : > { %p2331_p9 = pneg %p2330_p11 }
 0xa0b   : > { %p2337_p0 = por %p2336_p12, %p2335_p7 }
 0xa0d   : > { %p2338_p4 = pnand %p2337_p0, %p2331_p9 }
 0xa0f   : > { %2341 = shalt.err (!%p2338_p4)
}
 0xa10   : > { %2012 = dma.vmem_to_hbm [thread:$0]  (%p3233_p13), %s1589_s29, 128, %s3060_s2, %s1575_s30  }
 0xa11 PF: > { %s3234_s17 = sld [smem:[#allocation19_spill]]  ;;  %s3235_s22 = sld [smem:[#allocation31_spill]] }
 0xa12   : > { %p2035_p1 = scmp.ge.s32.totalorder %s2444_s18, 2 }
 0xa17   : > { %s1600_s14 = sand.u32 1, %s3234_s17   ;;  %p3236_p3 = scmp.ne.s32.totalorder %s3235_s22, 0 }
 0xa18   : > { %s1601_s11 = scalar_lea.sflag [#allocation5], %s1600_s14 }
 0xa19   : > { %p2031_p5 = pnand %p2035_p1, %p3236_p3 }
 0xa1b   : > { %2399 = dma.done.wait (!%p2031_p5), %s1601_s11, 128  }
 0xa1c   : > { %2401 = vsyncadd (!%p2031_p5), %s1601_s11, 4294967168  ;;  %s35_s18 = sadd.s32 1, %s2444_s18   ;;  %s3237_s25 = sld [smem:[#allocation17_spill]] }
 0xa1d   : > { %p32_p10 = scmp.ge.s32.totalorder %s35_s18, 6   ;;  %s3238_s26 = sld [smem:[#allocation18_spill]] }
 0xa1e   : > { %s3239_s27 = sld [smem:[#allocation27_spill]]  ;;  %s3240_s28 = sld [smem:[#allocation20_spill]] }
 0xa1f   : > { %s3241_s29 = sld [smem:[#allocation21_spill]]  ;;  %s3242_s30 = sld [smem:[#allocation30_spill]] }
 0xa20   : > { %s3243_s14 = sld [smem:[#allocation24_spill]]  ;;  %s3244_s15 = sld [smem:[#allocation25_spill]] }
 0xa21   : > { %s3245_s16 = sld [smem:[#allocation26_spill]]  ;;  %s3246_s17 = sld [smem:[#allocation28_spill]] }
 0xa22   :  { %34 = sbr.rel (!%p32_p10) target bundleno = 28 (0x1c), region = 197 }
 0xa29   :  { %1606 = vsyncpa [#allocation4], 1 }
 0xa2a   :  { %1608 = vsyncpa [#allocation4 + $0x1], 1 }
 0xa2b   :  { %1609 = vsyncpa [#allocation7], 1 }
 0xa2c   :  { %1611 = vsyncpa [#allocation7 + $0x1], 1 }
 0xa2d   :  { %1612 = vsyncpa [#allocation10], 1 }
 0xa2e   :  { %1614 = vsyncpa [#allocation10 + $0x1], 1 }
 0xa2f   :  { %1615 = vsyncpa [#allocation5], 1 }
 0xa30   :  { %1617 = vsyncpa [#allocation5 + $0x1], 1 }

</bundles_post_ra>
